<compile_context>
chip_gen: v7x
topology: tpu7x:2x2x1
jax: 0.10.0
libtpu: 0.0.40
codegen_flags: <defaults>
</compile_context>

<pallas_src>
import functools

import jax
import jax.numpy as jnp
from jax.experimental import pallas as pl
from jax.experimental.pallas import tpu as pltpu


# ----------------------------- Pallas kernel ---------------------------------
def gvsa_kernel(feats_ref, gath_ref,
                wq_ref, bq_ref,
                wpm1_ref, bpm1_ref, wpm2_ref, bpm2_ref,
                wpb1_ref, bpb1_ref, wpb2_ref, bpb2_ref,
                ww1_ref, bw1_ref, ww2_ref, bw2_ref,
                expand_ref,
                out_ref, *, mm_dtype):
    TN = feats_ref.shape[1]            # query points in this tile
    P = gath_ref.shape[1]              # TN * S gathered neighbor rows
    S = P // TN
    C = out_ref.shape[2]
    G = ww2_ref.shape[0]

    def mm(a, b):
        # MXU matmul with (optionally) bf16 operands and f32 accumulation.
        return jnp.dot(a.astype(mm_dtype), b.astype(mm_dtype),
                       preferred_element_type=jnp.float32)

    # ---- query projection (Linear + folded BN + ReLU) for this tile ---------
    q = jnp.maximum(mm(feats_ref[0], wq_ref[...]) + bq_ref[...], 0.0)    # [TN, C]

    # ---- gathered [k | v | (coord_q - coord_k)] per neighbor row ------------
    g = gath_ref[0]                                                      # [P, 2C+3]
    k_g = g[:, :C]
    v_g = g[:, C:2 * C]
    pos = g[:, 2 * C:]

    rel0 = (k_g.reshape(TN, S, C) - q[:, None, :]).reshape(P, C)         # k - q

    # ---- positional encodings: K=3 first layers on the VPU (3 FMAs) ---------
    def pe_hidden(w_ref, b_ref):
        h = (pos[:, 0:1] * w_ref[0:1, :]
             + pos[:, 1:2] * w_ref[1:2, :]
             + pos[:, 2:3] * w_ref[2:3, :]
             + b_ref[...])
        return jnp.maximum(h, 0.0)                                       # [P, C]

    pem = mm(pe_hidden(wpm1_ref, bpm1_ref), wpm2_ref[...]) + bpm2_ref[...]   # [P, C]
    peb = mm(pe_hidden(wpb1_ref, bpb1_ref), wpb2_ref[...]) + bpb2_ref[...]   # [P, C]

    rel = rel0 * pem + peb
    val = v_g + peb

    # ---- weight encoding ------------------------------------------------------
    wh = jnp.maximum(mm(rel, ww1_ref[...]) + bw1_ref[...], 0.0)          # [P, G]
    w = mm(wh, ww2_ref[...]) + bw2_ref[...]                              # [P, G]

    # ---- softmax over the neighbor axis ---------------------------------------
    w3 = w.reshape(TN, S, G)
    m = jnp.max(w3, axis=1, keepdims=True)
    e = jnp.exp(w3 - m)
    w3 = e * pl.reciprocal(jnp.sum(e, axis=1, keepdims=True), approx=True)
    # attn_drop is the identity in eval mode.

    # ---- grouped weighted aggregation ------------------------------------------
    wch = mm(w3.reshape(P, G), expand_ref[...])                          # [P, C]
    out = jnp.sum((val * wch).reshape(TN, S, C), axis=1)                 # [TN, C]
    out_ref[0] = out.astype(out_ref.dtype)


# ------------------------------ wrapper ---------------------------------------
def _pick_query_tile(n, cap=128):
    if n <= cap:
        return n
    for t in range(cap, 0, -1):
        if n % t == 0 and t % 8 == 0:
            return t
    return n


def grouped_vector_sa(feats, coords, index, params, *,
                      query_tile=None, mm_dtype=jnp.bfloat16):
    B, N, C = feats.shape
    S = index.shape[2]
    G = params["ww2"].shape[0]
    assert C % G == 0

    TN = query_tile if query_tile is not None else _pick_query_tile(N)
    assert N % TN == 0
    NT = N // TN
    W = 2 * C + 3

    # --- XLA side: k/v projections and the neighbor gather ----------------------
    # TODO(synk): move the neighbor gather in-kernel once Mosaic grows a general
    # dynamic-gather lowering (jnp.take with P != N output rows).
    k = jax.nn.relu(feats @ params["wk"] + params["bk"])
    v = feats @ params["wv"] + params["bv"]
    kv = jnp.concatenate([k, v], axis=-1)                                # [B, N, 2C]
    idx = index.reshape(B, N * S)
    kv_g = jnp.take_along_axis(kv, idx[:, :, None], axis=1)              # [B, N*S, 2C]
    c_g = jnp.take_along_axis(coords, idx[:, :, None], axis=1)           # [B, N*S, 3]
    pos = (coords[:, :, None, :] - c_g.reshape(B, N, S, 3)).reshape(B, N * S, 3)
    gath = jnp.concatenate([kv_g, pos], axis=-1)                         # [B, N*S, 2C+3]

    # group -> channel expansion matrix (constant 0/1)
    ci = C // G
    expand = (jnp.arange(C)[None, :] // ci
              == jnp.arange(G)[:, None]).astype(jnp.float32)             # [G, C]

    def row(x):  # biases as [1, X] rows for clean 2-D broadcasting in-kernel
        return x.reshape(1, -1)

    weight_args = [
        params["wq"], row(params["bq"]),
        params["wpm1"], row(params["bpm1"]), params["wpm2"], row(params["bpm2"]),
        params["wpb1"], row(params["bpb1"]), params["wpb2"], row(params["bpb2"]),
        params["ww1"], row(params["bw1"]), params["ww2"], row(params["bw2"]),
        expand,
    ]

    def full_spec(arr):
        nd = arr.ndim
        return pl.BlockSpec(arr.shape, lambda b, t, _nd=nd: (0,) * _nd)

    in_specs = [
        pl.BlockSpec((1, TN, C), lambda b, t: (b, t, 0)),        # feats (query tile)
        pl.BlockSpec((1, TN * S, W), lambda b, t: (b, t, 0)),    # gathered [k|v|pos]
    ] + [full_spec(a) for a in weight_args]

    out_spec = pl.BlockSpec((1, TN, C), lambda b, t: (b, t, 0))

    # advisory cost model for XLA scheduling around the kernel
    P = N * S
    flops = B * (2 * N * C * C                       # q projection
                 + 4 * P * C * C                     # PE second layers
                 + 2 * P * C * G + 2 * P * G * G     # weight encoding
                 + 2 * P * G * C                     # group -> channel expansion
                 + 20 * P * C)                       # VPU elementwise tail
    transcendentals = B * P * G
    bytes_accessed = 4 * (feats.size + gath.size + B * N * C
                          + sum(int(a.size) for a in weight_args))

    kernel = functools.partial(gvsa_kernel, mm_dtype=mm_dtype)

    return pl.pallas_call(
        kernel,
        out_shape=jax.ShapeDtypeStruct((B, N, C), feats.dtype),
        grid=(B, NT),
        in_specs=in_specs,
        out_specs=out_spec,
        compiler_params=pltpu.CompilerParams(
            # No cross-tile state: both grid axes are independent, so both can
            # be sharded across TensorCores (matters on v7x's 2 TCs at B == 1).
            dimension_semantics=("parallel", "parallel")),
        cost_estimate=pl.CostEstimate(flops=flops,
                                      transcendentals=transcendentals,
                                      bytes_accessed=bytes_accessed),
    )(feats, gath, *weight_args)


# ------------------------- parameter construction -----------------------------
def _make_linear(key, fin, fout):
    kw, kb = jax.random.split(key)
    lim = 1.0 / (fin ** 0.5)
    w = jax.random.uniform(kw, (fin, fout), jnp.float32, -lim, lim)
    b = jax.random.uniform(kb, (fout,), jnp.float32, -lim, lim)
    return w, b


def _make_bn_fold(key, c, eps=1e-5):
    k1, k2, k3, k4 = jax.random.split(key, 4)
    gamma = jax.random.uniform(k1, (c,), jnp.float32, 0.5, 1.5)
    beta = 0.1 * jax.random.normal(k2, (c,), jnp.float32)
    mean = 0.1 * jax.random.normal(k3, (c,), jnp.float32)
    var = jax.random.uniform(k4, (c,), jnp.float32, 0.5, 1.5)
    scale = gamma / jnp.sqrt(var + eps)
    shift = beta - mean * scale
    return scale, shift


def _fold(w, b, scale, shift):
    # (x @ w + b) * scale + shift  ==  x @ (w*scale) + (b*scale + shift)
    return w * scale[None, :], b * scale + shift


def init_raw_params(key, C, G):
    """Per-layer (BN-folded, eval-mode) weights, PyTorch-equivalent semantics."""
    ks = jax.random.split(key, 12)
    p = {}
    wq, bq = _make_linear(ks[0], C, C)
    sq, tq = _make_bn_fold(ks[1], C)
    p["wq"], p["bq"] = _fold(wq, bq, sq, tq)
    wk, bk = _make_linear(ks[2], C, C)
    sk, tk = _make_bn_fold(ks[3], C)
    p["wk"], p["bk"] = _fold(wk, bk, sk, tk)
    p["wv"], p["bv"] = _make_linear(ks[4], C, C)
    wpm1, bpm1 = _make_linear(ks[5], 3, C)
    spm, tpm = _make_bn_fold(ks[6], C)
    p["wpm1"], p["bpm1"] = _fold(wpm1, bpm1, spm, tpm)
    p["wpm2"], p["bpm2"] = _make_linear(ks[7], C, C)
    wpb1, bpb1 = _make_linear(ks[8], 3, C)
    spb, tpb = _make_bn_fold(ks[9], C)
    p["wpb1"], p["bpb1"] = _fold(wpb1, bpb1, spb, tpb)
    p["wpb2"], p["bpb2"] = _make_linear(ks[10], C, C)
    kw1, kw2, kw3 = jax.random.split(ks[11], 3)
    ww1, bw1 = _make_linear(kw1, C, G)
    sw, tw = _make_bn_fold(kw2, G)
    p["ww1"], p["bw1"] = _fold(ww1, bw1, sw, tw)
    p["ww2"], p["bw2"] = _make_linear(kw3, G, G)
    return p


# ------------------------- pure-JAX reference ----------------------------------
def reference(feats, coords, index, raw):
    B, N, C = feats.shape
    S = index.shape[2]
    G = raw["ww2"].shape[0]
    q = jax.nn.relu(feats @ raw["wq"] + raw["bq"])
    k = jax.nn.relu(feats @ raw["wk"] + raw["bk"])
    v = feats @ raw["wv"] + raw["bv"]
    idx = index.reshape(B, N * S)
    kg = jnp.take_along_axis(k, idx[:, :, None], axis=1).reshape(B, N, S, C)
    vg = jnp.take_along_axis(v, idx[:, :, None], axis=1).reshape(B, N, S, C)
    cg = jnp.take_along_axis(coords, idx[:, :, None], axis=1).reshape(B, N, S, 3)
    rel = kg - q[:, :, None, :]
    pos = coords[:, :, None, :] - cg
    pem = jax.nn.relu(pos @ raw["wpm1"] + raw["bpm1"]) @ raw["wpm2"] + raw["bpm2"]
    peb = jax.nn.relu(pos @ raw["wpb1"] + raw["bpb1"]) @ raw["wpb2"] + raw["bpb2"]
    rel = rel * pem + peb
    vg = vg + peb
    w = jax.nn.relu(rel @ raw["ww1"] + raw["bw1"]) @ raw["ww2"] + raw["bw2"]
    w = jax.nn.softmax(w, axis=2)
    vg = vg.reshape(B, N, S, G, C // G)
    out = jnp.einsum("bnsgi,bnsg->bngi", vg, w).reshape(B, N, C)
    return out


if __name__ == "__main__":
    B, N, S, C, G = 2, 8, 4, 32, 4   # embed_channels=32, groups=4, 4 neighbors

    key = jax.random.PRNGKey(0)
    kf, kc, ki, kp = jax.random.split(key, 4)
    feats = jax.random.normal(kf, (B, N, C), jnp.float32)
    coords = jax.random.normal(kc, (B, N, 3), jnp.float32)
    index = jax.random.randint(ki, (B, N, S), 0, N, jnp.int32)

    raw = init_raw_params(kp, C, G)

    out = grouped_vector_sa(feats, coords, index, raw)   # default: bf16 MXU, f32 acc
    out = jax.block_until_ready(out)

    ref = reference(feats, coords, index, raw)
    assert out.shape == (B, N, C)
    max_err = float(jnp.max(jnp.abs(out - ref)))
    # In-kernel matmuls use bf16 operands with f32 accumulation (per the perf
    # review); mm_dtype=jnp.float32 matches the reference to ~1e-5.
    if max_err > 5e-2:
        raise RuntimeError(f"Pallas kernel mismatch vs reference, max abs err={max_err}")

    print("KERNEL_OK")
</pallas_src>

<mosaic_0001>
module attributes {stable_mosaic.version = 11 : i64} {
  func.func @gvsa_kernel(%arg0: i32, %arg1: i32, %arg2: memref<1x8x32xf32, #tpu.memory_space<vmem>>, %arg3: memref<1x32x67xf32, #tpu.memory_space<vmem>>, %arg4: memref<32x32xf32, #tpu.memory_space<vmem>>, %arg5: memref<1x32xf32, #tpu.memory_space<vmem>>, %arg6: memref<3x32xf32, #tpu.memory_space<vmem>>, %arg7: memref<1x32xf32, #tpu.memory_space<vmem>>, %arg8: memref<32x32xf32, #tpu.memory_space<vmem>>, %arg9: memref<1x32xf32, #tpu.memory_space<vmem>>, %arg10: memref<3x32xf32, #tpu.memory_space<vmem>>, %arg11: memref<1x32xf32, #tpu.memory_space<vmem>>, %arg12: memref<32x32xf32, #tpu.memory_space<vmem>>, %arg13: memref<1x32xf32, #tpu.memory_space<vmem>>, %arg14: memref<32x4xf32, #tpu.memory_space<vmem>>, %arg15: memref<1x4xf32, #tpu.memory_space<vmem>>, %arg16: memref<4x4xf32, #tpu.memory_space<vmem>>, %arg17: memref<1x4xf32, #tpu.memory_space<vmem>>, %arg18: memref<4x32xf32, #tpu.memory_space<vmem>>, %arg19: memref<1x8x32xf32, #tpu.memory_space<vmem>>) attributes {dimension_semantics = [#tpu.dimension_semantics<parallel>, #tpu.dimension_semantics<parallel>], iteration_bounds = array<i64: 2, 1>, scalar_prefetch = 0 : i64, scratch_operands = 0 : i64, tpu.core_type = #tpu.core_type<tc>, window_params = [{transform_indices = @transform_0, window_bounds = array<i64: 1, 8, 32>}, {transform_indices = @transform_1, window_bounds = array<i64: 1, 32, 67>}, {pipeline_mode = #tpu.pipeline_mode<synchronous>, transform_indices = @transform_2, window_bounds = array<i64: 32, 32>}, {pipeline_mode = #tpu.pipeline_mode<synchronous>, transform_indices = @transform_3, window_bounds = array<i64: 1, 32>}, {pipeline_mode = #tpu.pipeline_mode<synchronous>, transform_indices = @transform_4, window_bounds = array<i64: 3, 32>}, {pipeline_mode = #tpu.pipeline_mode<synchronous>, transform_indices = @transform_5, window_bounds = array<i64: 1, 32>}, {pipeline_mode = #tpu.pipeline_mode<synchronous>, transform_indices = @transform_6, window_bounds = array<i64: 32, 32>}, {pipeline_mode = #tpu.pipeline_mode<synchronous>, transform_indices = @transform_7, window_bounds = array<i64: 1, 32>}, {pipeline_mode = #tpu.pipeline_mode<synchronous>, transform_indices = @transform_8, window_bounds = array<i64: 3, 32>}, {pipeline_mode = #tpu.pipeline_mode<synchronous>, transform_indices = @transform_9, window_bounds = array<i64: 1, 32>}, {pipeline_mode = #tpu.pipeline_mode<synchronous>, transform_indices = @transform_10, window_bounds = array<i64: 32, 32>}, {pipeline_mode = #tpu.pipeline_mode<synchronous>, transform_indices = @transform_11, window_bounds = array<i64: 1, 32>}, {pipeline_mode = #tpu.pipeline_mode<synchronous>, transform_indices = @transform_12, window_bounds = array<i64: 32, 4>}, {pipeline_mode = #tpu.pipeline_mode<synchronous>, transform_indices = @transform_13, window_bounds = array<i64: 1, 4>}, {pipeline_mode = #tpu.pipeline_mode<synchronous>, transform_indices = @transform_14, window_bounds = array<i64: 4, 4>}, {pipeline_mode = #tpu.pipeline_mode<synchronous>, transform_indices = @transform_15, window_bounds = array<i64: 1, 4>}, {pipeline_mode = #tpu.pipeline_mode<synchronous>, transform_indices = @transform_16, window_bounds = array<i64: 4, 32>}, {transform_indices = @transform_17, window_bounds = array<i64: 1, 8, 32>}]} {
    %c0 = arith.constant 0 : index
    %c0_0 = arith.constant 0 : index
    %c0_1 = arith.constant 0 : index
    %0 = vector.load %arg2[%c0, %c0_0, %c0_1] : memref<1x8x32xf32, #tpu.memory_space<vmem>>, vector<1x8x32xf32>
    %1 = vector.shape_cast %0 : vector<1x8x32xf32> to vector<8x32xf32>
    %c0_2 = arith.constant 0 : index
    %c0_3 = arith.constant 0 : index
    %2 = vector.load %arg4[%c0_2, %c0_3] : memref<32x32xf32, #tpu.memory_space<vmem>>, vector<32x32xf32>
    %3 = arith.truncf %1 : vector<8x32xf32> to vector<8x32xbf16>
    %4 = arith.truncf %2 : vector<32x32xf32> to vector<32x32xbf16>
    %cst = arith.constant dense<0.000000e+00> : vector<8x32xf32>
    %5 = tpu.matmul %3, %4, %cst {dimension_numbers = #tpu.dot_dimension_numbers<[1], [0], [0], [1], [0, 0, 1, 1], [], []>} : vector<8x32xbf16>, vector<32x32xbf16>, vector<8x32xf32> -> vector<8x32xf32>
    %c0_4 = arith.constant 0 : index
    %c0_5 = arith.constant 0 : index
    %6 = vector.load %arg5[%c0_4, %c0_5] : memref<1x32xf32, #tpu.memory_space<vmem>>, vector<1x32xf32>
    %7 = vector.broadcast %6 : vector<1x32xf32> to vector<8x32xf32>
    %8 = arith.addf %5, %7 : vector<8x32xf32>
    %cst_6 = arith.constant 0.000000e+00 : f32
    %9 = vector.broadcast %cst_6 : f32 to vector<8x32xf32>
    %10 = arith.maximumf %8, %9 : vector<8x32xf32>
    %c0_7 = arith.constant 0 : index
    %c0_8 = arith.constant 0 : index
    %c0_9 = arith.constant 0 : index
    %11 = vector.load %arg3[%c0_7, %c0_8, %c0_9] : memref<1x32x67xf32, #tpu.memory_space<vmem>>, vector<1x32x67xf32>
    %12 = vector.shape_cast %11 : vector<1x32x67xf32> to vector<32x67xf32>
    %13 = vector.extract_strided_slice %12 {offsets = [0, 0], sizes = [32, 32], strides = [1, 1]} : vector<32x67xf32> to vector<32x32xf32>
    %14 = vector.extract_strided_slice %12 {offsets = [0, 32], sizes = [32, 32], strides = [1, 1]} : vector<32x67xf32> to vector<32x32xf32>
    %15 = vector.extract_strided_slice %12 {offsets = [0, 64], sizes = [32, 3], strides = [1, 1]} : vector<32x67xf32> to vector<32x3xf32>
    %16 = vector.shape_cast %13 : vector<32x32xf32> to vector<8x4x32xf32>
    %17 = vector.shape_cast %10 : vector<8x32xf32> to vector<8x1x32xf32>
    %18 = vector.broadcast %17 : vector<8x1x32xf32> to vector<8x4x32xf32>
    %19 = arith.subf %16, %18 : vector<8x4x32xf32>
    %20 = vector.shape_cast %19 : vector<8x4x32xf32> to vector<32x32xf32>
    %21 = vector.extract_strided_slice %15 {offsets = [0, 0], sizes = [32, 1], strides = [1, 1]} : vector<32x3xf32> to vector<32x1xf32>
    %c0_10 = arith.constant 0 : index
    %c0_11 = arith.constant 0 : index
    %22 = vector.load %arg6[%c0_10, %c0_11] : memref<3x32xf32, #tpu.memory_space<vmem>>, vector<1x32xf32>
    %23 = vector.broadcast %21 : vector<32x1xf32> to vector<32x32xf32>
    %24 = vector.broadcast %22 : vector<1x32xf32> to vector<32x32xf32>
    %25 = arith.mulf %23, %24 : vector<32x32xf32>
    %26 = vector.extract_strided_slice %15 {offsets = [0, 1], sizes = [32, 1], strides = [1, 1]} : vector<32x3xf32> to vector<32x1xf32>
    %c1 = arith.constant 1 : index
    %c0_12 = arith.constant 0 : index
    %27 = vector.load %arg6[%c1, %c0_12] : memref<3x32xf32, #tpu.memory_space<vmem>>, vector<1x32xf32>
    %28 = vector.broadcast %26 : vector<32x1xf32> to vector<32x32xf32>
    %29 = vector.broadcast %27 : vector<1x32xf32> to vector<32x32xf32>
    %30 = arith.mulf %28, %29 : vector<32x32xf32>
    %31 = arith.addf %25, %30 : vector<32x32xf32>
    %32 = vector.extract_strided_slice %15 {offsets = [0, 2], sizes = [32, 1], strides = [1, 1]} : vector<32x3xf32> to vector<32x1xf32>
    %c2 = arith.constant 2 : index
    %c0_13 = arith.constant 0 : index
    %33 = vector.load %arg6[%c2, %c0_13] : memref<3x32xf32, #tpu.memory_space<vmem>>, vector<1x32xf32>
    %34 = vector.broadcast %32 : vector<32x1xf32> to vector<32x32xf32>
    %35 = vector.broadcast %33 : vector<1x32xf32> to vector<32x32xf32>
    %36 = arith.mulf %34, %35 : vector<32x32xf32>
    %37 = arith.addf %31, %36 : vector<32x32xf32>
    %c0_14 = arith.constant 0 : index
    %c0_15 = arith.constant 0 : index
    %38 = vector.load %arg7[%c0_14, %c0_15] : memref<1x32xf32, #tpu.memory_space<vmem>>, vector<1x32xf32>
    %39 = vector.broadcast %38 : vector<1x32xf32> to vector<32x32xf32>
    %40 = arith.addf %37, %39 : vector<32x32xf32>
    %cst_16 = arith.constant 0.000000e+00 : f32
    %41 = vector.broadcast %cst_16 : f32 to vector<32x32xf32>
    %42 = arith.maximumf %40, %41 : vector<32x32xf32>
    %c0_17 = arith.constant 0 : index
    %c0_18 = arith.constant 0 : index
    %43 = vector.load %arg8[%c0_17, %c0_18] : memref<32x32xf32, #tpu.memory_space<vmem>>, vector<32x32xf32>
    %44 = arith.truncf %42 : vector<32x32xf32> to vector<32x32xbf16>
    %45 = arith.truncf %43 : vector<32x32xf32> to vector<32x32xbf16>
    %cst_19 = arith.constant dense<0.000000e+00> : vector<32x32xf32>
    %46 = tpu.matmul %44, %45, %cst_19 {dimension_numbers = #tpu.dot_dimension_numbers<[1], [0], [0], [1], [0, 0, 1, 1], [], []>} : vector<32x32xbf16>, vector<32x32xbf16>, vector<32x32xf32> -> vector<32x32xf32>
    %c0_20 = arith.constant 0 : index
    %c0_21 = arith.constant 0 : index
    %47 = vector.load %arg9[%c0_20, %c0_21] : memref<1x32xf32, #tpu.memory_space<vmem>>, vector<1x32xf32>
    %48 = vector.broadcast %47 : vector<1x32xf32> to vector<32x32xf32>
    %49 = arith.addf %46, %48 : vector<32x32xf32>
    %50 = vector.extract_strided_slice %15 {offsets = [0, 0], sizes = [32, 1], strides = [1, 1]} : vector<32x3xf32> to vector<32x1xf32>
    %c0_22 = arith.constant 0 : index
    %c0_23 = arith.constant 0 : index
    %51 = vector.load %arg10[%c0_22, %c0_23] : memref<3x32xf32, #tpu.memory_space<vmem>>, vector<1x32xf32>
    %52 = vector.broadcast %50 : vector<32x1xf32> to vector<32x32xf32>
    %53 = vector.broadcast %51 : vector<1x32xf32> to vector<32x32xf32>
    %54 = arith.mulf %52, %53 : vector<32x32xf32>
    %55 = vector.extract_strided_slice %15 {offsets = [0, 1], sizes = [32, 1], strides = [1, 1]} : vector<32x3xf32> to vector<32x1xf32>
    %c1_24 = arith.constant 1 : index
    %c0_25 = arith.constant 0 : index
    %56 = vector.load %arg10[%c1_24, %c0_25] : memref<3x32xf32, #tpu.memory_space<vmem>>, vector<1x32xf32>
    %57 = vector.broadcast %55 : vector<32x1xf32> to vector<32x32xf32>
    %58 = vector.broadcast %56 : vector<1x32xf32> to vector<32x32xf32>
    %59 = arith.mulf %57, %58 : vector<32x32xf32>
    %60 = arith.addf %54, %59 : vector<32x32xf32>
    %61 = vector.extract_strided_slice %15 {offsets = [0, 2], sizes = [32, 1], strides = [1, 1]} : vector<32x3xf32> to vector<32x1xf32>
    %c2_26 = arith.constant 2 : index
    %c0_27 = arith.constant 0 : index
    %62 = vector.load %arg10[%c2_26, %c0_27] : memref<3x32xf32, #tpu.memory_space<vmem>>, vector<1x32xf32>
    %63 = vector.broadcast %61 : vector<32x1xf32> to vector<32x32xf32>
    %64 = vector.broadcast %62 : vector<1x32xf32> to vector<32x32xf32>
    %65 = arith.mulf %63, %64 : vector<32x32xf32>
    %66 = arith.addf %60, %65 : vector<32x32xf32>
    %c0_28 = arith.constant 0 : index
    %c0_29 = arith.constant 0 : index
    %67 = vector.load %arg11[%c0_28, %c0_29] : memref<1x32xf32, #tpu.memory_space<vmem>>, vector<1x32xf32>
    %68 = vector.broadcast %67 : vector<1x32xf32> to vector<32x32xf32>
    %69 = arith.addf %66, %68 : vector<32x32xf32>
    %cst_30 = arith.constant 0.000000e+00 : f32
    %70 = vector.broadcast %cst_30 : f32 to vector<32x32xf32>
    %71 = arith.maximumf %69, %70 : vector<32x32xf32>
    %c0_31 = arith.constant 0 : index
    %c0_32 = arith.constant 0 : index
    %72 = vector.load %arg12[%c0_31, %c0_32] : memref<32x32xf32, #tpu.memory_space<vmem>>, vector<32x32xf32>
    %73 = arith.truncf %71 : vector<32x32xf32> to vector<32x32xbf16>
    %74 = arith.truncf %72 : vector<32x32xf32> to vector<32x32xbf16>
    %cst_33 = arith.constant dense<0.000000e+00> : vector<32x32xf32>
    %75 = tpu.matmul %73, %74, %cst_33 {dimension_numbers = #tpu.dot_dimension_numbers<[1], [0], [0], [1], [0, 0, 1, 1], [], []>} : vector<32x32xbf16>, vector<32x32xbf16>, vector<32x32xf32> -> vector<32x32xf32>
    %c0_34 = arith.constant 0 : index
    %c0_35 = arith.constant 0 : index
    %76 = vector.load %arg13[%c0_34, %c0_35] : memref<1x32xf32, #tpu.memory_space<vmem>>, vector<1x32xf32>
    %77 = vector.broadcast %76 : vector<1x32xf32> to vector<32x32xf32>
    %78 = arith.addf %75, %77 : vector<32x32xf32>
    %79 = arith.mulf %20, %49 : vector<32x32xf32>
    %80 = arith.addf %79, %78 : vector<32x32xf32>
    %81 = arith.addf %14, %78 : vector<32x32xf32>
    %c0_36 = arith.constant 0 : index
    %c0_37 = arith.constant 0 : index
    %82 = vector.load %arg14[%c0_36, %c0_37] : memref<32x4xf32, #tpu.memory_space<vmem>>, vector<32x4xf32>
    %83 = arith.truncf %80 : vector<32x32xf32> to vector<32x32xbf16>
    %84 = arith.truncf %82 : vector<32x4xf32> to vector<32x4xbf16>
    %cst_38 = arith.constant dense<0.000000e+00> : vector<32x4xf32>
    %85 = tpu.matmul %83, %84, %cst_38 {dimension_numbers = #tpu.dot_dimension_numbers<[1], [0], [0], [1], [0, 0, 1, 1], [], []>} : vector<32x32xbf16>, vector<32x4xbf16>, vector<32x4xf32> -> vector<32x4xf32>
    %c0_39 = arith.constant 0 : index
    %c0_40 = arith.constant 0 : index
    %86 = vector.load %arg15[%c0_39, %c0_40] : memref<1x4xf32, #tpu.memory_space<vmem>>, vector<1x4xf32>
    %87 = vector.broadcast %86 : vector<1x4xf32> to vector<32x4xf32>
    %88 = arith.addf %85, %87 : vector<32x4xf32>
    %cst_41 = arith.constant 0.000000e+00 : f32
    %89 = vector.broadcast %cst_41 : f32 to vector<32x4xf32>
    %90 = arith.maximumf %88, %89 : vector<32x4xf32>
    %c0_42 = arith.constant 0 : index
    %c0_43 = arith.constant 0 : index
    %91 = vector.load %arg16[%c0_42, %c0_43] : memref<4x4xf32, #tpu.memory_space<vmem>>, vector<4x4xf32>
    %92 = arith.truncf %90 : vector<32x4xf32> to vector<32x4xbf16>
    %93 = arith.truncf %91 : vector<4x4xf32> to vector<4x4xbf16>
    %cst_44 = arith.constant dense<0.000000e+00> : vector<32x4xf32>
    %94 = tpu.matmul %92, %93, %cst_44 {dimension_numbers = #tpu.dot_dimension_numbers<[1], [0], [0], [1], [0, 0, 1, 1], [], []>} : vector<32x4xbf16>, vector<4x4xbf16>, vector<32x4xf32> -> vector<32x4xf32>
    %c0_45 = arith.constant 0 : index
    %c0_46 = arith.constant 0 : index
    %95 = vector.load %arg17[%c0_45, %c0_46] : memref<1x4xf32, #tpu.memory_space<vmem>>, vector<1x4xf32>
    %96 = vector.broadcast %95 : vector<1x4xf32> to vector<32x4xf32>
    %97 = arith.addf %94, %96 : vector<32x4xf32>
    %98 = vector.shape_cast %97 : vector<32x4xf32> to vector<8x4x4xf32>
    %cst_47 = arith.constant dense<0xFF800000> : vector<8x4xf32>
    %99 = vector.multi_reduction <maximumf>, %98, %cst_47 [1] : vector<8x4x4xf32> to vector<8x4xf32>
    %100 = vector.shape_cast %99 : vector<8x4xf32> to vector<8x1x4xf32>
    %101 = vector.broadcast %100 : vector<8x1x4xf32> to vector<8x4x4xf32>
    %102 = arith.subf %98, %101 : vector<8x4x4xf32>
    %103 = math.exp %102 : vector<8x4x4xf32>
    %cst_48 = arith.constant dense<0.000000e+00> : vector<8x4xf32>
    %104 = vector.multi_reduction <add>, %103, %cst_48 [1] : vector<8x4x4xf32> to vector<8x4xf32>
    %105 = vector.shape_cast %104 : vector<8x4xf32> to vector<8x1x4xf32>
    %106 = tpu.reciprocal %105 {approx = true} : vector<8x1x4xf32> -> vector<8x1x4xf32>
    %107 = vector.broadcast %106 : vector<8x1x4xf32> to vector<8x4x4xf32>
    %108 = arith.mulf %103, %107 : vector<8x4x4xf32>
    %109 = vector.shape_cast %108 : vector<8x4x4xf32> to vector<32x4xf32>
    %c0_49 = arith.constant 0 : index
    %c0_50 = arith.constant 0 : index
    %110 = vector.load %arg18[%c0_49, %c0_50] : memref<4x32xf32, #tpu.memory_space<vmem>>, vector<4x32xf32>
    %111 = arith.truncf %109 : vector<32x4xf32> to vector<32x4xbf16>
    %112 = arith.truncf %110 : vector<4x32xf32> to vector<4x32xbf16>
    %cst_51 = arith.constant dense<0.000000e+00> : vector<32x32xf32>
    %113 = tpu.matmul %111, %112, %cst_51 {dimension_numbers = #tpu.dot_dimension_numbers<[1], [0], [0], [1], [0, 0, 1, 1], [], []>} : vector<32x4xbf16>, vector<4x32xbf16>, vector<32x32xf32> -> vector<32x32xf32>
    %114 = arith.mulf %81, %113 : vector<32x32xf32>
    %115 = vector.shape_cast %114 : vector<32x32xf32> to vector<8x4x32xf32>
    %cst_52 = arith.constant dense<0.000000e+00> : vector<8x32xf32>
    %116 = vector.multi_reduction <add>, %115, %cst_52 [1] : vector<8x4x32xf32> to vector<8x32xf32>
    %c0_53 = arith.constant 0 : index
    %c0_54 = arith.constant 0 : index
    %c0_55 = arith.constant 0 : index
    %117 = vector.load %arg19[%c0_53, %c0_54, %c0_55] : memref<1x8x32xf32, #tpu.memory_space<vmem>>, vector<1x8x32xf32>
    %118 = vector.shape_cast %117 : vector<1x8x32xf32> to vector<8x32xf32>
    %119 = vector.shape_cast %116 : vector<8x32xf32> to vector<1x8x32xf32>
    tpu.vector_store %arg19[%c0_53, %c0_54, %c0_55], %119 {strides = array<i32>} : memref<1x8x32xf32, #tpu.memory_space<vmem>>, vector<1x8x32xf32>,
    return
  }
  func.func @transform_0(%arg0: i32, %arg1: i32) -> (i32, i32, i32) {
    %c0_i32 = arith.constant 0 : i32
    %c0_i32_0 = arith.constant 0 : i32
    return %arg0, %arg1, %c0_i32 : i32, i32, i32
  }
  func.func @transform_1(%arg0: i32, %arg1: i32) -> (i32, i32, i32) {
    %c0_i32 = arith.constant 0 : i32
    %c0_i32_0 = arith.constant 0 : i32
    return %arg0, %arg1, %c0_i32 : i32, i32, i32
  }
  func.func @transform_2(%arg0: i32, %arg1: i32) -> (i32, i32) {
    %c0_i32 = arith.constant 0 : i32
    %c0_i32_0 = arith.constant 0 : i32
    %c0_i32_1 = arith.constant 0 : i32
    return %c0_i32, %c0_i32_0 : i32, i32
  }
  func.func @transform_3(%arg0: i32, %arg1: i32) -> (i32, i32) {
    %c0_i32 = arith.constant 0 : i32
    %c0_i32_0 = arith.constant 0 : i32
    %c0_i32_1 = arith.constant 0 : i32
    return %c0_i32, %c0_i32_0 : i32, i32
  }
  func.func @transform_4(%arg0: i32, %arg1: i32) -> (i32, i32) {
    %c0_i32 = arith.constant 0 : i32
    %c0_i32_0 = arith.constant 0 : i32
    %c0_i32_1 = arith.constant 0 : i32
    return %c0_i32, %c0_i32_0 : i32, i32
  }
  func.func @transform_5(%arg0: i32, %arg1: i32) -> (i32, i32) {
    %c0_i32 = arith.constant 0 : i32
    %c0_i32_0 = arith.constant 0 : i32
    %c0_i32_1 = arith.constant 0 : i32
    return %c0_i32, %c0_i32_0 : i32, i32
  }
  func.func @transform_6(%arg0: i32, %arg1: i32) -> (i32, i32) {
    %c0_i32 = arith.constant 0 : i32
    %c0_i32_0 = arith.constant 0 : i32
    %c0_i32_1 = arith.constant 0 : i32
    return %c0_i32, %c0_i32_0 : i32, i32
  }
  func.func @transform_7(%arg0: i32, %arg1: i32) -> (i32, i32) {
    %c0_i32 = arith.constant 0 : i32
    %c0_i32_0 = arith.constant 0 : i32
    %c0_i32_1 = arith.constant 0 : i32
    return %c0_i32, %c0_i32_0 : i32, i32
  }
  func.func @transform_8(%arg0: i32, %arg1: i32) -> (i32, i32) {
    %c0_i32 = arith.constant 0 : i32
    %c0_i32_0 = arith.constant 0 : i32
    %c0_i32_1 = arith.constant 0 : i32
    return %c0_i32, %c0_i32_0 : i32, i32
  }
  func.func @transform_9(%arg0: i32, %arg1: i32) -> (i32, i32) {
    %c0_i32 = arith.constant 0 : i32
    %c0_i32_0 = arith.constant 0 : i32
    %c0_i32_1 = arith.constant 0 : i32
    return %c0_i32, %c0_i32_0 : i32, i32
  }
  func.func @transform_10(%arg0: i32, %arg1: i32) -> (i32, i32) {
    %c0_i32 = arith.constant 0 : i32
    %c0_i32_0 = arith.constant 0 : i32
    %c0_i32_1 = arith.constant 0 : i32
    return %c0_i32, %c0_i32_0 : i32, i32
  }
  func.func @transform_11(%arg0: i32, %arg1: i32) -> (i32, i32) {
    %c0_i32 = arith.constant 0 : i32
    %c0_i32_0 = arith.constant 0 : i32
    %c0_i32_1 = arith.constant 0 : i32
    return %c0_i32, %c0_i32_0 : i32, i32
  }
  func.func @transform_12(%arg0: i32, %arg1: i32) -> (i32, i32) {
    %c0_i32 = arith.constant 0 : i32
    %c0_i32_0 = arith.constant 0 : i32
    %c0_i32_1 = arith.constant 0 : i32
    return %c0_i32, %c0_i32_0 : i32, i32
  }
  func.func @transform_13(%arg0: i32, %arg1: i32) -> (i32, i32) {
    %c0_i32 = arith.constant 0 : i32
    %c0_i32_0 = arith.constant 0 : i32
    %c0_i32_1 = arith.constant 0 : i32
    return %c0_i32, %c0_i32_0 : i32, i32
  }
  func.func @transform_14(%arg0: i32, %arg1: i32) -> (i32, i32) {
    %c0_i32 = arith.constant 0 : i32
    %c0_i32_0 = arith.constant 0 : i32
    %c0_i32_1 = arith.constant 0 : i32
    return %c0_i32, %c0_i32_0 : i32, i32
  }
  func.func @transform_15(%arg0: i32, %arg1: i32) -> (i32, i32) {
    %c0_i32 = arith.constant 0 : i32
    %c0_i32_0 = arith.constant 0 : i32
    %c0_i32_1 = arith.constant 0 : i32
    return %c0_i32, %c0_i32_0 : i32, i32
  }
  func.func @transform_16(%arg0: i32, %arg1: i32) -> (i32, i32) {
    %c0_i32 = arith.constant 0 : i32
    %c0_i32_0 = arith.constant 0 : i32
    %c0_i32_1 = arith.constant 0 : i32
    return %c0_i32, %c0_i32_0 : i32, i32
  }
  func.func @transform_17(%arg0: i32, %arg1: i32) -> (i32, i32, i32) {
    %c0_i32 = arith.constant 0 : i32
    %c0_i32_0 = arith.constant 0 : i32
    return %arg0, %arg1, %c0_i32 : i32, i32, i32
  }
}

</mosaic_0001>

<bundles_post_ra>
// kernel: tpu_custom_call.1
= control target key start
LH: loop header
LB: loop body
LE: loop exit
PB: predicated region body
PF: predicated region fallthrough
CT: control target
= control target key end

     0   :  { %s3346_s0 = inlined_call_operand.hbm [shape: f32[2,8,32], index: 0, kind: input, shape index: {}]   ;;  %s3347_s1 = inlined_call_operand.hbm [shape: f32[2,32,67], index: 1, kind: input, shape index: {}]   ;;  %s3348_s2 = inlined_call_operand.vmem [shape: f32[32,32], index: 2, kind: input, shape index: {}]   ;;  %s3349_s3 = inlined_call_operand.vmem [shape: f32[1,32], index: 3, kind: input, shape index: {}]   ;;  %s3350_s4 = inlined_call_operand.hbm [shape: f32[3,32], index: 4, kind: input, shape index: {}]   ;;  %s3351_s5 = inlined_call_operand.hbm [shape: f32[1,32], index: 5, kind: input, shape index: {}]   ;;  %s3352_s6 = inlined_call_operand.hbm [shape: f32[32,32], index: 6, kind: input, shape index: {}]   ;;  %s3353_s7 = inlined_call_operand.hbm [shape: f32[1,32], index: 7, kind: input, shape index: {}]   ;;  %s3354_s8 = inlined_call_operand.hbm [shape: f32[3,32], index: 8, kind: input, shape index: {}]   ;;  %s3355_s9 = inlined_call_operand.hbm [shape: f32[1,32], index: 9, kind: input, shape index: {}]   ;;  %s3356_s10 = inlined_call_operand.vmem [shape: f32[32,32], index: 10, kind: input, shape index: {}]   ;;  %s3357_s11 = inlined_call_operand.hbm [shape: f32[1,32], index: 11, kind: input, shape index: {}]   ;;  %s3358_s12 = inlined_call_operand.vmem [shape: f32[32,4], index: 12, kind: input, shape index: {}]   ;;  %s3359_s13 = inlined_call_operand.vmem [shape: f32[1,4], index: 13, kind: input, shape index: {}]   ;;  %s3360_s14 = inlined_call_operand.vmem [shape: f32[4,4], index: 14, kind: input, shape index: {}]   ;;  %s3361_s15 = inlined_call_operand.vmem [shape: f32[1,4], index: 15, kind: input, shape index: {}]   ;;  %s3362_s16 = inlined_call_operand.vmem [shape: f32[4,32], index: 16, kind: input, shape index: {}]   ;;  %s3363_s17 = inlined_call_operand.hbm [shape: f32[2,8,32], index: 17, kind: output, shape index: {}]  }
   0x1   :  { %3373 = sst [smem:[#allocation26_spill]] %s3346_s0 }
   0x2   :  { %3374 = sst [smem:[#allocation27_spill]] %s3347_s1 }
   0x3   :  { %3375 = sst [smem:[#allocation28_spill]] %s3349_s3 }
   0x4   :  { %3376 = sst [smem:[#allocation29_spill]] %s3350_s4 }
   0x5   :  { %3377 = sst [smem:[#allocation30_spill]] %s3351_s5 }
   0x6   :  { %3378 = sst [smem:[#allocation31_spill]] %s3352_s6 }
   0x7   :  { %3379 = sst [smem:[#allocation32_spill]] %s3353_s7 }
   0x8   :  { %3380 = sst [smem:[#allocation33_spill]] %s3354_s8 }
   0x9   :  { %3381 = sst [smem:[#allocation34_spill]] %s3355_s9 }
   0xa   :  { %3382 = sst [smem:[#allocation35_spill]] %s3357_s11 }
   0xb   :  { %3383 = sst [smem:[#allocation36_spill]] %s3359_s13 }
   0xc   :  { %3384 = sst [smem:[#allocation37_spill]] %s3360_s14 }
   0xd   :  { %3385 = sst [smem:[#allocation38_spill]] %s3361_s15 }
   0xe   :  { %3386 = sst [smem:[#allocation39_spill]] %s3362_s16 }
   0xf   :  { %3387 = sst [smem:[#allocation40_spill]] %s3363_s17 }
  0x10   :  { %22 = vsyncpa [#allocation3], 0 }
  0x11   :  { %24 = vsyncpa [#allocation3 + $0x1], 0 }
  0x12   :  { %25 = vsyncpa [#allocation6], 0 }
  0x13   :  { %27 = vsyncpa [#allocation6 + $0x1], 0 }
  0x14   :  { %28 = vsyncpa [#allocation9], 0 }
  0x15   :  { %29 = vsyncpa [#allocation12], 0 }
  0x16   :  { %30 = vsyncpa [#allocation15], 0 }
  0x17   :  { %31 = vsyncpa [#allocation4], 0 }
  0x18   :  { %33 = vsyncpa [#allocation4 + $0x1], 0  ;;  %s2724_s24 = smov 0   ;;  %s2726_s25 = smov 0  }
  0x19   :  { %s2728_s26 = smov 0   ;;  %s2730_s27 = smov 0  }
  0x1a   :  { %s2732_s28 = smov 0   ;;  %s2734_s29 = smov 0  }
  0x1b LB: > { %3388 = sst [smem:[#allocation25_spill]] %s2604_s27  ;;  %s2755_s0 = sadd.s32 4294967295, %s2612_s29   ;;  %s2612_s29 = sphi %s2734_s29, %s39_s29   ;;  %s2608_s28 = sphi %s2732_s28, %s3433_s28   ;;  %s2604_s27 = sphi %s2730_s27, %s3432_s27   ;;  %s2600_s26 = sphi %s2728_s26, %s3431_s26   ;;  %s2596_s25 = sphi %s2726_s25, %s3430_s25   ;;  %s2592_s24 = sphi %s2724_s24, %s3429_s24  }
  0x1c   : > { %p1942_p0 = scmp.ge.s32.totalorder %s2612_s29, 1  ;;  %p3367_p1 = scmp.eq.s32.totalorder %s2755_s0, 0 }
  0x1d   : > { %p455_p2 = scmp.lt.s32.totalorder %s2612_s29, 3  ;;  %s2614_s18 = smov [#allocation7]  }
  0x1e   : > { %s474_s19 = sshll.u32 %s2614_s18, 4  ;;  %s2615_s1 = smov [#allocation8]   ;;  %s475_s19 = int_to_ptr.vmem [resolvable:$true] %s474_s19 }
  0x1f   : > { %p2760_p3 = pnand %p1942_p0, %p455_p2  ;;  %s485_s20 = sshll.u32 %s2615_s1, 4  ;;  %s2773_s20 = int_to_ptr.vmem [resolvable:$true] %s485_s20 }
  0x20   : > { %s2616_s22 = smov [#allocation11]   ;;  %s3391_s4 = sld [smem:[#allocation29_spill]] }
  0x21   : > { %s3389_s30 = scalar_select %p2760_p3, 1, 0 }
  0x22   : > { %p2097_p5 = pneg %p2760_p3  ;;  %s509_s23 = sshll.u32 %s2616_s22, 4  ;;  %s2775_s23 = int_to_ptr.vmem [resolvable:$true] %s509_s23 }
  0x24   : > { %p2769_p6 = pnand %p2097_p5, %p3367_p1 }
  0x26   : > { %s2254_s27 = scalar_lea.hbm %s3391_s4, 64  ;;  %p2785_p8 = pneg %p2769_p6 }
  0x27   : > { %p2255_p7 = scmp.ne.s32.totalorder %s3391_s4, %s2254_s27  ;;  %p2261_p11 = scmp.lt.u32.totalorder %s2254_s27, %s3391_s4 }
  0x29   : > { %p2257_p9 = pnand %p2785_p8, %p2255_p7 }
  0x2b   : > { %p2258_p10 = pneg %p2257_p9 }
  0x2d   : > { %p2263_p12 = pnand %p2261_p11, %p2258_p10 }
  0x2f   : > { %2266 = shalt.err (!%p2263_p12)
}
  0x30   : > { %s2267_s17 = scalar_lea.vmem %s475_s19, 64  ;;  %p2275_p5 = scmp.lt.s32.totalorder %s475_s19, %s475_s19 }
  0x31   : > { %p2268_p13 = scmp.ne.s32.totalorder %s475_s19, %s2267_s17  ;;  %p2276_p4 = scmp.lt.s32.totalorder %s2267_s17, %s2267_s17 }
  0x33   : > { %p2270_p0 = pnand %p2268_p13, %p2785_p8  ;;  %p2277_p1 = por %p2276_p4, %p2275_p5 }
  0x35   : > { %p2271_p2 = pneg %p2270_p0 }
  0x37   : > { %p2278_p3 = pnand %p2277_p1, %p2271_p2 }
  0x39   : > { %2281 = shalt.err (!%p2278_p3)
}
  0x3a   : > { %2100 = dma.hbm_to_vmem [thread:$0]  (!%p2769_p6), %s3391_s4, 64, %s475_s19, [#allocation6]  }
  0x3b   : > { %s3393_s5 = sld [smem:[#allocation30_spill]] }
  0x41   : > { %s2282_s18 = scalar_lea.hbm %s3393_s5, 16 }
  0x42   : > { %p2283_p7 = scmp.ne.s32.totalorder %s3393_s5, %s2282_s18  ;;  %p2289_p1 = scmp.lt.u32.totalorder %s2282_s18, %s3393_s5 }
  0x44   : > { %p2285_p9 = pnand %p2283_p7, %p2785_p8 }
  0x46   : > { %p2286_p4 = pneg %p2285_p9 }
  0x48   : > { %p2291_p3 = pnand %p2289_p1, %p2286_p4 }
  0x4a   : > { %2294 = shalt.err (!%p2291_p3)
}
  0x4b   : > { %s2295_s19 = scalar_lea.vmem %s2773_s20, 16  ;;  %s2302_s14 = scalar_lea.vmem %s2773_s20, 32 }
  0x4c   : > { %p2296_p10 = scmp.ne.s32.totalorder %s2773_s20, %s2295_s19  ;;  %p2303_p13 = scmp.lt.s32.totalorder %s2773_s20, %s2773_s20 }
  0x4d   : > { %p2304_p0 = scmp.lt.s32.totalorder %s2302_s14, %s2295_s19 }
  0x4e   : > { %p2298_p11 = pnand %p2296_p10, %p2785_p8 }
  0x4f   : > { %p2305_p2 = por %p2304_p0, %p2303_p13 }
  0x50   : > { %p2299_p12 = pneg %p2298_p11 }
  0x52   : > { %p2306_p5 = pnand %p2305_p2, %p2299_p12 }
  0x54   : > { %2309 = shalt.err (!%p2306_p5)
}
  0x55   : > { %2103 = dma.hbm_to_vmem [thread:$0]  (!%p2769_p6), %s3393_s5, 16, %s2773_s20, [#allocation9]  }
  0x56   : > { %s3394_s7 = sld [smem:[#allocation32_spill]] }
  0x5c   : > { %s2310_s27 = scalar_lea.hbm %s3394_s7, 16 }
  0x5d   : > { %p2311_p7 = scmp.ne.s32.totalorder %s3394_s7, %s2310_s27  ;;  %p2317_p1 = scmp.lt.u32.totalorder %s2310_s27, %s3394_s7 }
  0x5f   : > { %p2313_p9 = pnand %p2311_p7, %p2785_p8 }
  0x61   : > { %p2314_p4 = pneg %p2313_p9 }
  0x63   : > { %p2319_p3 = pnand %p2317_p1, %p2314_p4 }
  0x65   : > { %2322 = shalt.err (!%p2319_p3)
}
  0x66   : > { %s2323_s20 = scalar_lea.vmem %s2775_s23, 16  ;;  %s2330_s14 = scalar_lea.vmem %s2775_s23, 32 }
  0x67   : > { %p2324_p10 = scmp.ne.s32.totalorder %s2775_s23, %s2323_s20  ;;  %p2331_p13 = scmp.lt.s32.totalorder %s2775_s23, %s2775_s23 }
  0x68   : > { %p2332_p0 = scmp.lt.s32.totalorder %s2330_s14, %s2323_s20 }
  0x69   : > { %p2326_p11 = pnand %p2324_p10, %p2785_p8 }
  0x6a   : > { %p2333_p2 = por %p2332_p0, %p2331_p13 }
  0x6b   : > { %p2327_p12 = pneg %p2326_p11 }
  0x6d   : > { %p2334_p5 = pnand %p2333_p2, %p2327_p12 }
  0x6f   : > { %2337 = shalt.err (!%p2334_p5)
}
  0x70   : > { %2109 = dma.hbm_to_vmem [thread:$0]  (!%p2769_p6), %s3394_s7, 16, %s2775_s23, [#allocation12]  }
  0x71   : > { %s2617_s16 = smov [#allocation14]   ;;  %s2618_s27 = smov [#allocation10]  }
  0x72   : > { %s531_s13 = sshll.u32 %s2617_s16, 4  ;;  %s495_s18 = sshll.u32 %s2618_s27, 4  ;;  %s532_s13 = int_to_ptr.vmem [resolvable:$true] %s531_s13  ;;  %s496_s18 = int_to_ptr.vmem [resolvable:$true] %s495_s18 }
  0x73   : > { %s3395_s9 = sld [smem:[#allocation34_spill]] }
  0x79   : > { %s2338_s19 = scalar_lea.hbm %s3395_s9, 16 }
  0x7a   : > { %p2339_p7 = scmp.ne.s32.totalorder %s3395_s9, %s2338_s19  ;;  %p2345_p1 = scmp.lt.u32.totalorder %s2338_s19, %s3395_s9 }
  0x7c   : > { %p2341_p9 = pnand %p2339_p7, %p2785_p8 }
  0x7e   : > { %p2342_p4 = pneg %p2341_p9 }
  0x80   : > { %p2347_p3 = pnand %p2345_p1, %p2342_p4 }
  0x82   : > { %2350 = shalt.err (!%p2347_p3)
}
  0x83   : > { %s2351_s23 = scalar_lea.vmem %s532_s13, 16  ;;  %s2358_s15 = scalar_lea.vmem %s532_s13, 32 }
  0x84   : > { %p2352_p10 = scmp.ne.s32.totalorder %s532_s13, %s2351_s23  ;;  %p2359_p13 = scmp.lt.s32.totalorder %s532_s13, %s532_s13 }
  0x85   : > { %p2360_p0 = scmp.lt.s32.totalorder %s2358_s15, %s2351_s23 }
  0x86   : > { %p2354_p11 = pnand %p2352_p10, %p2785_p8 }
  0x87   : > { %p2361_p2 = por %p2360_p0, %p2359_p13 }
  0x88   : > { %p2355_p12 = pneg %p2354_p11 }
  0x8a   : > { %p2362_p5 = pnand %p2361_p2, %p2355_p12 }
  0x8c   : > { %2365 = shalt.err (!%p2362_p5)
}
  0x8d   : > { %2115 = dma.hbm_to_vmem [thread:$0]  (!%p2769_p6), %s3395_s9, 16, %s532_s13, [#allocation15]  }
  0x8e   : > { %s3396_s6 = sld [smem:[#allocation31_spill]] }
  0x94   : > { %s2366_s17 = scalar_lea.hbm %s3396_s6, 512 }
  0x95   : > { %p2367_p7 = scmp.ne.s32.totalorder %s3396_s6, %s2366_s17  ;;  %p2373_p1 = scmp.lt.u32.totalorder %s2366_s17, %s3396_s6 }
  0x97   : > { %p2369_p9 = pnand %p2367_p7, %p2785_p8 }
  0x99   : > { %p2370_p4 = pneg %p2369_p9 }
  0x9b   : > { %p2375_p3 = pnand %p2373_p1, %p2370_p4 }
  0x9d   : > { %2378 = shalt.err (!%p2375_p3)
}
  0x9e   : > { %s2379_s23 = scalar_lea.vmem %s496_s18, 512  ;;  %p2387_p13 = scmp.lt.s32.totalorder %s496_s18, %s496_s18 }
  0x9f   : > { %p2380_p10 = scmp.ne.s32.totalorder %s496_s18, %s2379_s23  ;;  %p2388_p0 = scmp.lt.s32.totalorder %s2379_s23, %s2379_s23 }
  0xa1   : > { %p2382_p11 = pnand %p2380_p10, %p2785_p8  ;;  %p2389_p2 = por %p2388_p0, %p2387_p13 }
  0xa3   : > { %p2383_p12 = pneg %p2382_p11 }
  0xa5   : > { %p2390_p5 = pnand %p2389_p2, %p2383_p12 }
  0xa7   : > { %2393 = shalt.err (!%p2390_p5)
}
  0xa8   : > { %s3369_s13 = smov 128   ;;  %s3370_s15 = smov 8  }
  0xa9   : > { %2106 = dma.hbm_to_vmem [thread:$0]  (!%p2769_p6), %s3396_s6, 512, %s496_s18, [#allocation9], %s3369_s13, %s3369_s13, %s3370_s15  }
  0xaa   : > { %s2621_s4 = smov [#allocation13]   ;;  %s2622_s17 = smov [#allocation16]  }
  0xab   : > { %s520_s22 = sshll.u32 %s2621_s4, 4  ;;  %s545_s19 = sshll.u32 %s2622_s17, 4  ;;  %s521_s22 = int_to_ptr.vmem [resolvable:$true] %s520_s22  ;;  %s546_s19 = int_to_ptr.vmem [resolvable:$true] %s545_s19 }
  0xac   : > { %s3397_s8 = sld [smem:[#allocation33_spill]] }
  0xb2   : > { %s2394_s3 = scalar_lea.hbm %s3397_s8, 64 }
  0xb3   : > { %p2395_p7 = scmp.ne.s32.totalorder %s3397_s8, %s2394_s3  ;;  %p2401_p1 = scmp.lt.u32.totalorder %s2394_s3, %s3397_s8 }
  0xb5   : > { %p2397_p9 = pnand %p2395_p7, %p2785_p8 }
  0xb7   : > { %p2398_p4 = pneg %p2397_p9 }
  0xb9   : > { %p2403_p3 = pnand %p2401_p1, %p2398_p4 }
  0xbb   : > { %2406 = shalt.err (!%p2403_p3)
}
  0xbc   : > { %s2407_s18 = scalar_lea.vmem %s521_s22, 64  ;;  %p2415_p13 = scmp.lt.s32.totalorder %s521_s22, %s521_s22 }
  0xbd   : > { %p2408_p10 = scmp.ne.s32.totalorder %s521_s22, %s2407_s18  ;;  %p2416_p0 = scmp.lt.s32.totalorder %s2407_s18, %s2407_s18 }
  0xbf   : > { %p2410_p11 = pnand %p2408_p10, %p2785_p8  ;;  %p2417_p2 = por %p2416_p0, %p2415_p13 }
  0xc1   : > { %p2411_p12 = pneg %p2410_p11 }
  0xc3   : > { %p2418_p5 = pnand %p2417_p2, %p2411_p12 }
  0xc5   : > { %2421 = shalt.err (!%p2418_p5)
}
  0xc6   : > { %2112 = dma.hbm_to_vmem [thread:$0]  (!%p2769_p6), %s3397_s8, 64, %s521_s22, [#allocation12]  }
  0xc7   : > { %s3398_s11 = sld [smem:[#allocation35_spill]] }
  0xcd   : > { %s2422_s27 = scalar_lea.hbm %s3398_s11, 16 }
  0xce   : > { %p2423_p7 = scmp.ne.s32.totalorder %s3398_s11, %s2422_s27  ;;  %p2429_p1 = scmp.lt.u32.totalorder %s2422_s27, %s3398_s11 }
  0xd0   : > { %p2425_p9 = pnand %p2423_p7, %p2785_p8 }
  0xd2   : > { %p2426_p4 = pneg %p2425_p9 }
  0xd4   : > { %p2431_p3 = pnand %p2429_p1, %p2426_p4 }
  0xd6   : > { %2434 = shalt.err (!%p2431_p3)
}
  0xd7   : > { %s2435_s3 = scalar_lea.vmem %s546_s19, 16  ;;  %s2442_s22 = scalar_lea.vmem %s546_s19, 32 }
  0xd8   : > { %p2436_p10 = scmp.ne.s32.totalorder %s546_s19, %s2435_s3  ;;  %p2443_p13 = scmp.lt.s32.totalorder %s546_s19, %s546_s19 }
  0xd9   : > { %p2444_p0 = scmp.lt.s32.totalorder %s2442_s22, %s2435_s3 }
  0xda   : > { %p2438_p11 = pnand %p2436_p10, %p2785_p8 }
  0xdb   : > { %p2445_p2 = por %p2444_p0, %p2443_p13 }
  0xdc   : > { %p2439_p12 = pneg %p2438_p11 }
  0xde   : > { %p2446_p5 = pnand %p2445_p2, %p2439_p12 }
  0xe0   : > { %2449 = shalt.err (!%p2446_p5)
}
  0xe1   : > { %2118 = dma.hbm_to_vmem [thread:$0]  (!%p2769_p6), %s3398_s11, 16, %s546_s19, [#allocation15]  }
  0xe2   : > { %s1941_s1 = sadd.s32 4294967294, %s2612_s29   ;;  %s51_s5 = sadd.s32 1, %s2608_s28 }
  0xe3   : > { %s60_s21 = sadd.s32 1, %s2600_s26  ;;  %p53_p8 = scmp.ge.s32.totalorder %s51_s5, 2 }
  0xe4   : > { %p67_p7 = scmp.ne.s32.totalorder %s2600_s26, %s2596_s25  ;;  %p68_p9 = scmp.eq.s32.totalorder %s2612_s29, 0 }
  0xe5   : > { %p73_p4 = scmp.ne.s32.totalorder %s2596_s25, %s2592_s24  ;;  %s3435_s5 = smov (%p53_p8, %s51_s5), 0 }
  0xe6   : > { %p2934_p1 = por %p68_p9, %p67_p7  ;;  %p3400_p3 = scmp.eq.s32.totalorder %s2755_s0, 0 }
  0xe7   : > { %s55_s7 = ssub.s32 %s2608_s28, %s3435_s5  ;;  %p442_p10 = scmp.eq.s32.totalorder %s2755_s0, 1 }
  0xe8   : > { %p2940_p6 = por %p3400_p3, %p73_p4  ;;  %p58_p11 = scmp.eq.s32.totalorder %s55_s7, 0 }
  0xe9   : > { %p448_p12 = scmp.eq.s32.totalorder %s1941_s1, 1  ;;  %p2947_p13 = por %p442_p10, %p67_p7 }
  0xea   : > { %p2137_p0 = scmp.lt.s32.totalorder %s2612_s29, 2  ;;  %s2960_s17 = sand.u32 1, %s2600_s26  }
  0xeb   : > { %s3402_s9 = scalar_select %p2947_p13, 1, 0 }
  0xec   : > { %s2953_s27 = scalar_select %p58_p11, %s2600_s26, %s60_s21  }
  0xed   : > { %p2955_p2 = por %p448_p12, %p73_p4  ;;  %s1951_s20 = sshll.u32 %s2960_s17, 3 }
  0xee   : > { %s1952_s14 = sshll.u32 %s2608_s28, 7  ;;  %s3404_s23 = sld [smem:[#allocation26_spill]] }
  0xef   : > { %s3403_s4 = scalar_select %p2955_p2, 1, 0 }
  0xf0   : > { %s575_s1 = scalar_lea.vmem [#allocation2], %s1951_s20  ;;  %p2973_p5 = pnand %p2137_p0, %p2934_p1 }
  0xf1   : > { %s583_s21 = sshll.u32 %s575_s1, 4  ;;  %s1953_s13 = sshll.u32 %s2960_s17, 5  ;;  %s2969_s21 = int_to_ptr.vmem [resolvable:$true] %s583_s21 }
  0xf2   : > { %s572_s3 = scalar_lea.sflag [#allocation3], %s2960_s17  ;;  %p2452_p7 = pneg %p2973_p5 }
  0xf4   : > { %s2967_s18 = scalar_lea.hbm %s3404_s23, %s1952_s14  ;;  %s2455_s16 = scalar_lea.hbm %s3404_s23, 256 }
  0xf5   : > { %s2450_s14 = scalar_lea.hbm %s2967_s18, 128  ;;  %p2456_p1 = scmp.lt.u32.totalorder %s2967_s18, %s3404_s23 }
  0xf6   : > { %p2451_p8 = scmp.ne.s32.totalorder %s2967_s18, %s2450_s14  ;;  %p2457_p3 = scmp.lt.u32.totalorder %s2455_s16, %s2450_s14 }
  0xf7   : > { %p2459_p11 = scmp.lt.u32.totalorder %s2450_s14, %s2967_s18 }
  0xf8   : > { %p2453_p9 = pnand %p2452_p7, %p2451_p8  ;;  %p2458_p10 = por %p2457_p3, %p2456_p1 }
  0xfa   : > { %p2454_p4 = pneg %p2453_p9  ;;  %p2460_p12 = por %p2459_p11, %p2458_p10 }
  0xfc   : > { %p2461_p0 = pnand %p2460_p12, %p2454_p4 }
  0xfe   : > { %2464 = shalt.err (!%p2461_p0)
}
  0xff   : > { %s2465_s15 = scalar_lea.vmem %s2969_s21, 128  ;;  %s2623_s20 = smov [#allocation2]  }
 0x100   : > { %p2466_p8 = scmp.ne.s32.totalorder %s2969_s21, %s2465_s15  ;;  %s2470_s22 = sshll.u32 %s2623_s20, 4  ;;  %s2471_s22 = int_to_ptr.vmem [resolvable:$false] %s2470_s22 }
 0x101   : > { %s2472_s6 = scalar_lea.vmem %s2471_s22, 256  ;;  %p2473_p13 = scmp.lt.s32.totalorder %s2969_s21, %s2471_s22 }
 0x102   : > { %p2468_p9 = pnand %p2466_p8, %p2452_p7  ;;  %p2474_p1 = scmp.lt.s32.totalorder %s2472_s6, %s2465_s15 }
 0x104   : > { %p2469_p2 = pneg %p2468_p9  ;;  %p2475_p3 = por %p2474_p1, %p2473_p13 }
 0x106   : > { %p2476_p10 = pnand %p2475_p3, %p2469_p2 }
 0x108   : > { %2479 = shalt.err (!%p2476_p10)
}
 0x109   : > { %2122 = dma.hbm_to_vmem [thread:$0]  (!%p2973_p5), %s2967_s18, 128, %s2969_s21, %s572_s3  }
 0x10a   : > { %s594_s14 = scalar_lea.vmem [#allocation5], %s1953_s13  ;;  %s590_s1 = sand.u32 1, %s2612_s29  }
 0x10b   : > { %s603_s16 = sshll.u32 %s594_s14, 4  ;;  %s3406_s20 = sshll.u32 %s2608_s28, 9  ;;  %s3008_s16 = int_to_ptr.vmem [resolvable:$true] %s603_s16 }
 0x10c   : > { %s3407_s6 = sld [smem:[#allocation27_spill]]  ;;  %s3017_s11 = scalar_lea.sflag [#allocation6], %s590_s1 }
 0x112   : > { %s3015_s8 = scalar_lea.hbm %s3407_s6, %s3406_s20  ;;  %s2485_s18 = scalar_lea.hbm %s3407_s6, 1024 }
 0x113   : > { %s2480_s23 = scalar_lea.hbm %s3015_s8, 512  ;;  %p2486_p11 = scmp.lt.u32.totalorder %s3015_s8, %s3407_s6 }
 0x114   : > { %p2481_p13 = scmp.ne.s32.totalorder %s3015_s8, %s2480_s23  ;;  %p2487_p12 = scmp.lt.u32.totalorder %s2485_s18, %s2480_s23 }
 0x115   : > { %p2489_p8 = scmp.lt.u32.totalorder %s2480_s23, %s3015_s8 }
 0x116   : > { %p2483_p2 = pnand %p2481_p13, %p2452_p7  ;;  %p2488_p0 = por %p2487_p12, %p2486_p11 }
 0x118   : > { %p2484_p4 = pneg %p2483_p2  ;;  %p2490_p9 = por %p2489_p8, %p2488_p0 }
 0x11a   : > { %p2491_p1 = pnand %p2490_p9, %p2484_p4 }
 0x11c   : > { %2494 = shalt.err (!%p2491_p1)
}
 0x11d   : > { %s2495_s14 = scalar_lea.vmem %s3008_s16, 512  ;;  %s2624_s1 = smov [#allocation5]  }
 0x11e   : > { %p2496_p3 = scmp.ne.s32.totalorder %s3008_s16, %s2495_s14  ;;  %s2500_s20 = sshll.u32 %s2624_s1, 4  ;;  %s2501_s20 = int_to_ptr.vmem [resolvable:$false] %s2500_s20 }
 0x11f   : > { %s2502_s15 = scalar_lea.vmem %s2501_s20, 1024  ;;  %p2503_p2 = scmp.lt.s32.totalorder %s3008_s16, %s2501_s20 }
 0x120   : > { %p2498_p10 = pnand %p2496_p3, %p2452_p7  ;;  %p2504_p11 = scmp.lt.s32.totalorder %s2502_s15, %s2495_s14 }
 0x122   : > { %p2499_p13 = pneg %p2498_p10  ;;  %p2505_p12 = por %p2504_p11, %p2503_p2 }
 0x124   : > { %p2506_p0 = pnand %p2505_p12, %p2499_p13 }
 0x126   : > { %2509 = shalt.err (!%p2506_p0)
}
 0x127   : > { %s3408_s23 = smov 8   ;;  %s3409_s22 = smov 128  }
 0x128   : > { %2125 = dma.hbm_to_vmem [thread:$0]  (!%p2973_p5), %s3015_s8, 512, %s3008_s16, %s3017_s11, %s3409_s22, %s3409_s22, %s3408_s23  }
 0x129   : > { %p3410_p7 = scmp.ne.s32.totalorder %s3389_s30, 0 }
 0x12a   : > { %s3049_s13 = sand.u32 (!%p3410_p7), 1, %s2596_s25  }
 0x12b   : > { %615 = sbr.rel (%p3410_p7) target bundleno = 1710 (0x6ae), region = 88  ;;  %s1957_s17 = sshll.u32 (!%p3410_p7), %s3049_s13, 3 }
 0x12c   : > { %s618_s18 = scalar_lea.sflag (!%p3410_p7), [#allocation3], %s3049_s13  ;;  %s3055_s7 = scalar_lea.vmem (!%p3410_p7), [#allocation2], %s1957_s17 }
 0x132   : > { %2563 = dma.done.wait (%p2940_p6), %s618_s18, 128  }
 0x133   : > { %2565 = vsyncadd (%p2940_p6), %s618_s18, 4294967168  ;;  %s626_s8 = sand.u32 1, %s2755_s0   ;;  %s1958_s11 = sshll.u32 %s3049_s13, 5 }
 0x134   : > { %s627_s30 = scalar_lea.sflag [#allocation6], %s626_s8  ;;  %s630_s16 = scalar_lea.vmem [#allocation5], %s1958_s11 }
 0x135   : > { %2567 = dma.done.wait (%p2940_p6), %s627_s30, 512  }
 0x136   : > { %2569 = vsyncadd (%p2940_p6), %s627_s30, 4294966784  ;;  %p3411_p5 = scmp.eq.s32.totalorder %s2755_s0, 0 }
 0x138   : > { %2571 = dma.done.wait (%p3411_p5), [#allocation6], 64   ;;  %p3412_p4 = pmov %p3411_p5 }
 0x13a   : > { %2573 = vsyncadd (%p3412_p4), [#allocation6], 4294967232  ;;  %p3413_p8 = pmov %p3412_p4 }
 0x13b   : > { %p3414_p9 = pmov %p3412_p4 }
 0x13c   : > { %2575 = dma.done.wait (%p3413_p8), [#allocation9], 528  }
 0x13d   : > { %2577 = vsyncadd (%p3414_p9), [#allocation9], 4294966768  ;;  %p3415_p1 = pmov %p3412_p4 }
 0x13f   : > { %2579 = dma.done.wait (%p3415_p1), [#allocation12], 80   ;;  %p3416_p3 = pmov %p3415_p1 }
 0x140   : > { %p3417_p6 = pmov %p3415_p1 }
 0x141   : > { %2581 = vsyncadd (%p3416_p3), [#allocation12], 4294967216 }
 0x142   : > { %2583 = dma.done.wait (%p3417_p6), [#allocation15], 32   ;;  %p3418_p10 = pmov %p3415_p1 }
 0x143   : > { %v2625_v0 = vmov 65   ;;  %v2626_v1 = vmov 64   ;;  %v3083_v2 = vld [vmem:[%s630_s16] sm:$0xff]  ;;  %v3087_v3 = vld [vmem:[%s630_s16 + $0x8] sm:$0xff]  ;;  %v3091_v4 = vld [vmem:[%s630_s16 + $0x10] sm:$0xff]  ;;  %v2627_v9 = vmov 0.0  }
 0x144   : > { %2585 = vsyncadd (%p3418_p10), [#allocation15], 4294967264  ;;  %2212 = vset.pattern.permute.xlu1 %v2625_v0  ;;  %2211 = vset.pattern.permute.xlu0 %v2626_v1  ;;  %v3093_v5 = vld [vmem:[%s630_s16 + $0x18] sm:$0xff]  ;;  %v717_v6 = vld [vmem:[%s3348_s2] sm:$0xff]  ;;  %v2628_v10 = vmov 66   ;;  %vm2629_vm0 = vmmov 0  }
 0x145   : > { %917 = vperm.xlu1 %2212, %v3083_v2   ;;  %892 = vperm.xlu0 %2211, %v3083_v2   ;;  %v718_v7 = vld [vmem:[%s3348_s2 + $0x8] sm:$0xff]  ;;  %v719_v11 = vld [vmem:[%s3348_s2 + $0x10] sm:$0xff]  ;;  %v720_v12 = vld [vmem:[%s3348_s2 + $0x18] sm:$0xff]  ;;  %vm731_vm1 = vcmask 261120   ;;  %s3419_s18 = sld [smem:[#allocation28_spill]]  ;;  %s2631_s8 = smov 32  }
 0x146   : > { %v722_v8 = vpack.c.bf16 %v718_v7, %v717_v6  ;;  %2017 = vmatprep.subr.bf16.mxu0 %v2627_v9  ;;  %v723_v13 = vpack.c.bf16 %v720_v12, %v719_v11  ;;  %v716_v14 = vld [vmem:[%s3055_s7] sm:$0xff]  ;;  %2021 = vmatprep.mubr.msk.bf16.mxu0 %vm2629_vm0, %v2627_v9  ;;  %v988_v16 = vld [vmem:[#allocation10] sm:$0xff]  ;;  %v1970_v34 = vld [vmem:[#allocation7 + $0x1] ss:$0 sm:$0xff]  ;;  %s3420_s30 = sld [smem:[#allocation37_spill]]  ;;  %vm1342_vm2 = vcmask 1041408  }
 0x147   : > { %v721_v15 = vpack.c.bf16 %v716_v14, %v716_v14  ;;  %v989_v17 = vld [vmem:[#allocation10 + $0x8] sm:$0xff]  ;;  %v1109_v20 = vld [vmem:[%s3356_s10 + $0x8] sm:$0xff]  ;;  %v1110_v24 = vld [vmem:[%s3356_s10 + $0x10] sm:$0xff]  ;;  %s3421_s19 = sld [smem:[#allocation36_spill]]  ;;  %vm1335_vm3 = vcmask 31744   ;;  %s3422_s14 = sld [smem:[#allocation39_spill]] }
 0x148   : > { %2018 = vmatpush3.bf16.msra.mxu0 %v722_v8  ;;  %v994_v18 = vpack.c.bf16 %v989_v17, %v988_v16  ;;  %v1108_v19 = vld [vmem:[%s3356_s10] sm:$0xff]  ;;  %v991_v23 = vld [vmem:[#allocation10 + $0x18] sm:$0xff]  ;;  %v1111_v26 = vld [vmem:[%s3356_s10 + $0x18] sm:$0xff]  ;;  %s3423_s15 = sld [smem:[#allocation38_spill]]  ;;  %vm1407_vm4 = vcmask 27648   ;;  %vm1670_vm5 = vcmask 519424  }
 0x149   : > { %921 = vperm.xlu1 %2212, %v3087_v3   ;;  %896 = vperm.xlu0 %2211, %v3087_v3   ;;  %v1114_v21 = vpack.c.bf16 %v1109_v20, %v1108_v19  ;;  %v990_v22 = vld [vmem:[#allocation10 + $0x10] sm:$0xff]  ;;  %v1115_v27 = vpack.c.bf16 %v1111_v26, %v1110_v24  ;;  %v1977_v35 = vld [vmem:[#allocation13 + $0x1] ss:$0 sm:$0xff]  ;;  %v1969_v36 = vld [vmem:[#allocation7] ss:$0 sm:$0xff]  ;;  %vm1735_vm6 = vcmask 1041409  }
 0x14a   : > { %2019 = vmatprep.subr.bf16.mxu0 %v2627_v9  ;;  %2025 = vmatprep.subr.bf16.mxu1 %v994_v18  ;;  %v995_v25 = vpack.c.bf16 %v991_v23, %v990_v22  ;;  %v1976_v37 = vld [vmem:[#allocation13] ss:$0 sm:$0xff]  ;;  %v1971_v48 = vld [vmem:[#allocation7 + $0x2] ss:$0 sm:$0xff]  ;;  %v1978_v49 = vld [vmem:[#allocation13 + $0x2] ss:$0 sm:$0xff] }
 0x14b   : > { %2026 = vmatpush3.bf16.msra.mxu1 %v994_v18  ;;  %v1979_v60 = vld [vmem:[#allocation14] ss:$0 sm:$0xff]  ;;  %v1972_v63 = vld [vmem:[#allocation8] ss:$0 sm:$0xff]  ;;  %vm1737_vm7 = vcmask 1042434   ;;  %vm1739_vm8 = vcmask 1043459  }
 0x14c   : > { %2020 = vmatpush3.bf16.msra.mxu0 %v723_v13  ;;  %2027 = vmatprep.subr.bf16.mxu1 %v995_v25  ;;  %vm1741_vm9 = vcmask 1044484   ;;  %s3424_s23 = sld [smem:[#allocation25_spill]]  ;;  %vm1743_vm10 = vcmask 1045509   ;;  %vm1745_vm11 = vcmask 1046534   ;;  %vm1747_vm12 = vcmask 1047559   ;;  %s2632_s22 = smov 96  }
 0x14d   : > { %2213 = vset.pattern.permute.xlu1 %v2626_v1  ;;  %900 = vperm.xlu0 %2211, %v3091_v4   ;;  %s3425_s16 = sld [smem:[#allocation40_spill]]  ;;  %p3426_p2 = scmp.ne.s32.totalorder %s3402_s9, 0 }
 0x14e   : > { %904 = vperm.xlu1 %2213, %v3093_v5   ;;  %2033 = vmatprep.subr.bf16.mxu0 %v1114_v21 }
 0x14f   : > { %2022 = vmatmul.mubr.msk.bf16.vlgmr.msra.gmra.mrb[0].mxu0 %vm731_vm1, %v721_v15  ;;  %2028 = vmatpush3.bf16.msra.mxu1 %v995_v25 }
 0x150   : > { %2034 = vmatpush3.bf16.msra.mxu0 %v1114_v21 }
 0x151   : > { %2214 = vset.pattern.permute.xlu0 %v2625_v0  ;;  %2035 = vmatprep.subr.bf16.mxu0 %v1115_v27 }
 0x152   : > { %2215 = vset.pattern.permute.xlu1 %v2625_v0  ;;  %925 = vperm.xlu0 %2214, %v3091_v4  }
 0x153   : > { %929 = vperm.xlu1 %2215, %v3093_v5  }
 0x154   : > { %2036 = vmatpush3.bf16.msra.mxu0 %v1115_v27 }
 0x156   : > { %2217 = vset.pattern.permute.xlu0 %v2628_v10 }
 0x157   : > { %2216 = vset.pattern.permute.xlu1 %v2628_v10  ;;  %950 = vperm.xlu0 %2217, %v3087_v3  }
 0x158   : > { %946 = vperm.xlu1 %2216, %v3083_v2  }
 0x15c   : > { %954 = vperm.xlu1 %2216, %v3091_v4  }
 0x160   : > { %958 = vperm.xlu1 %2216, %v3093_v5  }
 0x1c4   : > { %v918_v28 = vpop.permute.xlu1 %917  ;;  %v893_v29 = vpop.permute.xlu0 %892 }
 0x1c5   : > { %v936_v44 = vmul.f32 %v1970_v34, %v918_v28  ;;  %v1072_v45 = vmul.f32 %v1977_v35, %v918_v28  ;;  %v911_v46 = vmul.f32 %v1969_v36, %v893_v29  ;;  %v1063_v47 = vmul.f32 %v1976_v37, %v893_v29 }
 0x1c7   : > { %v940_v58 = vadd.f32 %v936_v44, %v911_v46  ;;  %v1076_v59 = vadd.f32 %v1072_v45, %v1063_v47 }
 0x1c8   : > { %v922_v30 = vpop.permute.xlu1 %921  ;;  %v897_v31 = vpop.permute.xlu0 %896 }
 0x1c9   : > { %v937_v39 = vmul.f32 %v1970_v34, %v922_v30  ;;  %v1073_v40 = vmul.f32 %v1977_v35, %v922_v30  ;;  %v912_v41 = vmul.f32 %v1969_v36, %v897_v31  ;;  %v1064_v42 = vmul.f32 %v1976_v37, %v897_v31 }
 0x1cb   : > { %v941_v50 = vadd.f32 %v937_v39, %v912_v41  ;;  %v1077_v51 = vadd.f32 %v1073_v40, %v1064_v42 }
 0x1cc   : > { %v901_v32 = vpop.permute.xlu0 %900 }
 0x1cd   : > { %v905_v33 = vpop.permute.xlu1 %904  ;;  %v913_v0 = vmul.f32 %v1969_v36, %v901_v32  ;;  %v1065_v1 = vmul.f32 %v1976_v37, %v901_v32 }
 0x1ce   : > { %v914_v21 = vmul.f32 %v1969_v36, %v905_v33  ;;  %v1066_v22 = vmul.f32 %v1976_v37, %v905_v33 }
 0x1d1   : > { %v926_v38 = vpop.permute.xlu0 %925 }
 0x1d2   : > { %v930_v43 = vpop.permute.xlu1 %929  ;;  %v938_v53 = vmul.f32 %v1970_v34, %v926_v38  ;;  %v1074_v54 = vmul.f32 %v1977_v35, %v926_v38 }
 0x1d3   : > { %v939_v8 = vmul.f32 %v1970_v34, %v930_v43  ;;  %v1075_v9 = vmul.f32 %v1977_v35, %v930_v43 }
 0x1d4   : > { %v942_v12 = vadd.f32 %v938_v53, %v913_v0  ;;  %v1078_v13 = vadd.f32 %v1074_v54, %v1065_v1  ;;  %v1235_v53 = vld [vmem:[%s3358_s12 + $0x8] sm:$0xff] }
 0x1d5   : > { %v943_v30 = vadd.f32 %v939_v8, %v914_v21  ;;  %v1079_v31 = vadd.f32 %v1075_v9, %v1066_v22  ;;  %v786_v21 = vcombine.high %v3091_v4, %v3091_v4 }
 0x1d6   : > { %v951_v52 = vpop.permute.xlu0 %950 }
 0x1d7   : > { %v966_v55 = vmul.f32 %v1971_v48, %v951_v52  ;;  %v1086_v56 = vmul.f32 %v1978_v49, %v951_v52  ;;  %v947_v57 = vpop.permute.xlu1 %946  ;;  %v1234_v52 = vld [vmem:[%s3358_s12] sm:$0xff] }
 0x1d8   : > { %v965_v61 = vmul.f32 %v1971_v48, %v947_v57  ;;  %v1085_v62 = vmul.f32 %v1978_v49, %v947_v57  ;;  %v1256_v54 = vpack.c.bf16 %v1235_v53, %v1234_v52 }
 0x1d9   : > { %v970_v6 = vadd.f32 %v966_v55, %v941_v50  ;;  %v1090_v7 = vadd.f32 %v1086_v56, %v1077_v51  ;;  %v1236_v55 = vld [vmem:[%s3358_s12 + $0x10] sm:$0xff]  ;;  %v1237_v56 = vld [vmem:[%s3358_s12 + $0x18] sm:$0xff] }
 0x1da   : > { %v969_v10 = vadd.f32 %v965_v61, %v940_v58  ;;  %v1089_v11 = vadd.f32 %v1085_v62, %v1076_v59  ;;  %2041 = vmatprep.subr.bf16.mxu1 %v1256_v54  ;;  %v1257_v57 = vpack.c.bf16 %v1237_v56, %v1236_v55  ;;  %v1967_v58 = vld [vmem:[%s3419_s18] ss:$0 sm:$0xff]  ;;  %v797_v62 = vlaneseq  ;;  %s1992_s18 = sshll.u32 %s3424_s23, 7 }
 0x1db   : > { %v1101_v14 = vadd.f32 %v1979_v60, %v1090_v7  ;;  %v955_v15 = vpop.permute.xlu1 %954  ;;  %v981_v16 = vadd.f32 %v1972_v63, %v970_v6  ;;  %s3296_s0 = scalar_lea.hbm %s3425_s16, %s1992_s18 }
 0x1dc   : > { %v1100_v17 = vadd.f32 %v1979_v60, %v1089_v11  ;;  %v967_v18 = vmul.f32 %v1971_v48, %v955_v15  ;;  %v1087_v19 = vmul.f32 %v1978_v49, %v955_v15  ;;  %v980_v20 = vadd.f32 %v1972_v63, %v969_v10 }
 0x1dd   : > { %v1105_v23 = vmax.f32 %v1101_v14, 0.0  ;;  %v985_v24 = vmax.f32 %v981_v16, 0.0  ;;  %v798_v1 = vshrl.u32 %v797_v62, 7 }
 0x1de   : > { %v1104_v25 = vmax.f32 %v1100_v17, 0.0  ;;  %v971_v26 = vadd.f32 %v967_v18, %v942_v12  ;;  %v1091_v27 = vadd.f32 %v1087_v19, %v1078_v13  ;;  %v984_v28 = vmax.f32 %v980_v20, 0.0 }
 0x1df   : > { %v959_v29 = vpop.permute.xlu1 %958  ;;  %v844_v16 = vsub.s32 0, %v798_v1 }
 0x1e0   : > { %v968_v32 = vmul.f32 %v1971_v48, %v959_v29  ;;  %v1088_v34 = vmul.f32 %v1978_v49, %v959_v29  ;;  %v992_v35 = vpack.c.bf16 %v985_v24, %v984_v28  ;;  %v1112_v38 = vpack.c.bf16 %v1105_v23, %v1104_v25  ;;  %v1973_v29 = vld [vmem:[#allocation11] ss:$0 sm:$0xff] }
 0x1e1   : > { %v982_v39 = vadd.f32 %v1972_v63, %v971_v26  ;;  %v1102_v40 = vadd.f32 %v1979_v60, %v1091_v27  ;;  %v784_v24 = vcombine.high %v3083_v2, %v3083_v2 }
 0x1e2   : > { %v972_v41 = vadd.f32 %v968_v32, %v943_v30  ;;  %v1092_v42 = vadd.f32 %v1088_v34, %v1079_v31  ;;  %2029 = vmatprep.mubr.msk.bf16.mxu1 %vm731_vm1, %v992_v35  ;;  %2037 = vmatprep.mubr.msk.bf16.mxu0 %vm731_vm1, %v1112_v38  ;;  %v1980_v30 = vld [vmem:[#allocation16] ss:$0 sm:$0xff]  ;;  %v787_v31 = vcombine.high %v3093_v5, %v3093_v5 }
 0x1e3   : > { %v986_v37 = vmax.f32 %v982_v39, 0.0  ;;  %v1106_v43 = vmax.f32 %v1102_v40, 0.0  ;;  %v785_v34 = vcombine.high %v3087_v3, %v3087_v3 }
 0x1e4   : > { %v983_v33 = vadd.f32 %v1972_v63, %v972_v41  ;;  %v1103_v36 = vadd.f32 %v1979_v60, %v1092_v42  ;;  %v2630_v60 = vmov 1966171168  }
 0x1e5   : > { %v795_v61 = vunpack.c.l.s4 %v2630_v60 }
 0x1e6   : > { %v987_v44 = vmax.f32 %v983_v33, 0.0  ;;  %v1107_v45 = vmax.f32 %v1103_v36, 0.0 }
 0x1e7   : > { %v796_v0 = vunpack.c.0.s8 %v795_v61 }
 0x1e8   : > { %v1113_v46 = vpack.c.bf16 %v1107_v45, %v1106_v43  ;;  %v993_v47 = vpack.c.bf16 %v987_v44, %v986_v37 }
 0x1e9   : > { %v799_v7 = vsub.s32 %v796_v0, %v798_v1 }
 0x1ea   : > { %2030 = vmatmul.mubr.msk.bf16.vlgmr.msra.gmra.mrb[0].mxu1 %vm731_vm1, %v993_v47  ;;  %2038 = vmatmul.mubr.msk.bf16.vlgmr.msra.gmra.mrb[4].mxu0 %vm731_vm1, %v1113_v46 }
 0x1eb   : > { %2042 = vmatpush3.bf16.msra.mxu1 %v1256_v54 }
 0x1ec   : > { %2043 = vmatprep.subr.bf16.mxu1 %v1257_v57 }
 0x1ef   : > { %2044 = vmatpush3.bf16.msra.mxu1 %v1257_v57 }
 0x222   : > { %v769_v48 = vpop.f32.mrb[0].mxu0 }
 0x223   : > { %v2023_v49 = vpop.f32.mrb[1].mxu0  ;;  %v770_v59 = vadd.f32 %v1967_v58, %v769_v48 }
 0x224   : > { %v772_v50 = vpop.f32.mrb[2].mxu0 }
 0x225   : > { %v2024_v51 = vpop.f32.mrb[3].mxu0  ;;  %v775_v63 = vmax.f32 %v770_v59, 0.0 }
 0x227   : > { %v793_v6 = vcombine.high %v775_v63, %v775_v63  ;;  %v800_v8 = vrot.slane %v775_v63, %v799_v7 }
 0x229   : > { %v807_v9 = vrot.slane %v793_v6, %v799_v7  ;;  %v808_v10 = vcombine.high %v800_v8, %v800_v8  ;;  %v816_v12 = vrot.slane %v800_v8, %v799_v7 }
 0x22b   : > { %v809_v11 = vcombine.high %v807_v9, %v807_v9  ;;  %v823_v13 = vrot.slane %v807_v9, %v799_v7  ;;  %v830_v14 = vrot.slane %v808_v10, %v799_v7  ;;  %v838_v17 = vcombine.high %v816_v12, %v816_v12 }
 0x22c   : > { %v845_v25 = vrot.slane %v816_v12, %v844_v16 }
 0x22d   : > { %v837_v15 = vrot.slane %v809_v11, %v799_v7  ;;  %v839_v18 = vcombine.high %v823_v13, %v823_v13  ;;  %v840_v19 = vcombine.high %v830_v14, %v830_v14  ;;  %v861_v22 = vrot.slane %v823_v13, %v844_v16 }
 0x22e   : > { %v849_v26 = vrot.slane %v830_v14, %v844_v16  ;;  %v853_v28 = vrot.slane %v838_v17, %v844_v16  ;;  %v882_v42 = vsub.f32 %v3083_v2, %v845_v25 }
 0x22f   : > { %v841_v20 = vcombine.high %v837_v15, %v837_v15  ;;  %v865_v23 = vrot.slane %v837_v15, %v844_v16  ;;  %v869_v27 = vrot.slane %v839_v18, %v844_v16  ;;  %v857_v35 = vrot.slane %v840_v19, %v844_v16 }
 0x230   : > { %v886_v38 = vsub.f32 %v3091_v4, %v861_v22  ;;  %v883_v33 = vsub.f32 %v784_v24, %v849_v26  ;;  %v884_v46 = vsub.f32 %v3087_v3, %v853_v28 }
 0x231   : > { %v873_v32 = vrot.slane %v841_v20, %v844_v16  ;;  %v887_v39 = vsub.f32 %v786_v21, %v865_v23  ;;  %v888_v45 = vsub.f32 %v3093_v5, %v869_v27  ;;  %v885_v52 = vsub.f32 %v785_v34, %v857_v35 }
 0x233   : > { %v889_v49 = vsub.f32 %v787_v31, %v873_v32  ;;  %v1983_v32 = vld [vmem:[%s3421_s19] ss:$0 sm:$0xff]  ;;  %s1754_s19 = scalar_lea.sflag [#allocation4], %s3049_s13 }
 0x2bd   : > { %v2031_v40 = vpop.f32.mrb[0].mxu1  ;;  %v2039_v41 = vpop.f32.mrb[4].mxu0 }
 0x2be   : > { %v1052_v36 = vadd.f32 %v2031_v40, %v1973_v29  ;;  %v1172_v37 = vadd.f32 %v2039_v41, %v1980_v30  ;;  %v1043_v43 = vpop.f32.mrb[1].mxu1  ;;  %v1163_v44 = vpop.f32.mrb[5].mxu0 }
 0x2bf   : > { %v1044_v47 = vadd.f32 %v1973_v29, %v1043_v43  ;;  %v1164_v48 = vadd.f32 %v1980_v30, %v1163_v44  ;;  %v2032_v50 = vpop.f32.mrb[2].mxu1  ;;  %v2040_v51 = vpop.f32.mrb[6].mxu0 }
 0x2c0   : > { %v1184_v53 = vcombine.high %v1052_v36, %v1052_v36  ;;  %v1194_v54 = vmul.f32 %v1052_v36, %v886_v38  ;;  %v1204_v55 = vcombine.high %v1172_v37, %v1172_v37  ;;  %v1055_v56 = vadd.f32 %v2032_v50, %v1973_v29  ;;  %v1046_v57 = vpop.f32.mrb[3].mxu1  ;;  %1222 = vrot.lane.b32.xlu1 %v1172_v37, %s2631_s8  ;;  %v1166_v58 = vpop.f32.mrb[7].mxu0  ;;  %v1986_v50 = vld [vmem:[%s3423_s15] ss:$0 sm:$0xff] }
 0x2c1   : > { %v1182_v59 = vcombine.high %v1044_v47, %v1044_v47  ;;  %v1190_v60 = vmul.f32 %v1044_v47, %v882_v42  ;;  %v1202_v61 = vcombine.high %v1164_v48, %v1164_v48  ;;  %v1175_v62 = vadd.f32 %v2040_v51, %v1980_v30  ;;  %1218 = vrot.lane.b32.xlu0 %v1164_v48, %s2631_s8  ;;  %v1560_v47 = vld [vmem:[%s3422_s14] sm:$0xf] }
 0x2c2   : > { %v1195_v63 = vmul.f32 %v1184_v53, %v887_v39  ;;  %v1214_v0 = vadd.f32 %v1194_v54, %v1172_v37  ;;  %v1185_v1 = vcombine.high %v1055_v56, %v1055_v56  ;;  %v1196_v6 = vmul.f32 %v1055_v56, %v888_v45 }
 0x2c3   : > { %v1191_v7 = vmul.f32 %v1182_v59, %v883_v33  ;;  %v1210_v8 = vadd.f32 %v1190_v60, %v1164_v48  ;;  %v1205_v9 = vcombine.high %v1175_v62, %v1175_v62  ;;  %v1047_v10 = vadd.f32 %v1973_v29, %v1046_v57  ;;  %v1324_v29 = vld [vmem:[%s3420_s30] sm:$0xf] }
 0x2c4   : > { %v1215_v11 = vadd.f32 %v1204_v55, %v1195_v63  ;;  %v1197_v12 = vmul.f32 %v1185_v1, %v889_v49  ;;  %v1216_v13 = vadd.f32 %v1196_v6, %v1175_v62  ;;  %v1167_v14 = vadd.f32 %v1980_v30, %v1166_v58 }
 0x2c5   : > { %v1211_v15 = vadd.f32 %v1202_v61, %v1191_v7  ;;  %v1183_v16 = vcombine.high %v1047_v10, %v1047_v10  ;;  %v1192_v17 = vmul.f32 %v1047_v10, %v884_v46  ;;  %v1327_v30 = vpack.c.bf16 %v1324_v29, %v1324_v29 }
 0x2c6   : > { %v1248_v18 = vcombine.low %v1214_v0, %v1215_v11  ;;  %v1217_v19 = vadd.f32 %v1205_v9, %v1197_v12  ;;  %1220 = vrot.lane.b32.xlu1 %v1167_v14, %s2631_s8  ;;  %v1203_v22 = vcombine.high %v1167_v14, %v1167_v14  ;;  %v1579_v48 = vpack.c.bf16 %v1560_v47, %v1560_v47 }
 0x2c7   : > { %v1246_v20 = vcombine.low %v1210_v8, %v1211_v15  ;;  %v1193_v21 = vmul.f32 %v1183_v16, %v885_v52  ;;  %v1212_v23 = vadd.f32 %v1192_v17, %v1167_v14  ;;  %2061 = vmatprep.subr.msk.bf16.mxu0 %vm1342_vm2, %v1327_v30  ;;  %v1344_v31 = vsel %vm1342_vm2, %v1327_v30, 0 }
 0x2c8   : > { %v1249_v24 = vcombine.low %v1216_v13, %v1217_v19  ;;  %2050 = vmatpush3.bf16.msra.mxu0 %v1344_v31  ;;  %2062 = vmatprep.subr.msk.bf16.mxu1 %vm1342_vm2, %v1579_v48  ;;  %v1587_v49 = vsel %vm1342_vm2, %v1579_v48, 0 }
 0x2c9   : > { %v1213_v25 = vadd.f32 %v1203_v22, %v1193_v21 }
 0x2ca   : > { %v1255_v26 = vpack.c.bf16 %v1249_v24, %v1248_v18  ;;  %1224 = vrot.lane.b32.xlu1 %v1175_v62, %s2631_s8 }
 0x2cb   : > { %v1247_v27 = vcombine.low %v1212_v23, %v1213_v25 }
 0x2cd   : > { %v1254_v28 = vpack.c.bf16 %v1247_v27, %v1246_v20 }
 0x2cf   : > { %2045 = vmatprep.mubr.msk.bf16.mxu1 %vm731_vm1, %v1254_v28 }
 0x2d0   : > { %2046 = vmatmul.mubr.msk.bf16.vlgmr.msra.gmra.mrb[4].mxu1 %vm731_vm1, %v1255_v26 }
 0x2d1   : > { %2056 = vmatpush3.bf16.msra.mxu1 %v1587_v49 }
 0x3a3   : > { %v2047_v34 = vpop.f32.mrb[4].mxu1 }
 0x3a4   : > { %v1314_v35 = vadd.f32 %v2047_v34, %v1983_v32  ;;  %v1305_v38 = vpop.f32.mrb[5].mxu1 }
 0x3a5   : > { %v1306_v39 = vadd.f32 %v1983_v32, %v1305_v38  ;;  %v2048_v40 = vpop.f32.mrb[6].mxu1 }
 0x3a6   : > { %v1317_v41 = vadd.f32 %v2048_v40, %v1983_v32  ;;  %v1308_v42 = vpop.f32.mrb[7].mxu1  ;;  %v1322_v36 = vmax.f32 %v1314_v35, 0.0 }
 0x3a7   : > { %v1309_v33 = vadd.f32 %v1983_v32, %v1308_v42  ;;  %v1320_v43 = vmax.f32 %v1306_v39, 0.0 }
 0x3a8   : > { %v1323_v37 = vmax.f32 %v1317_v41, 0.0 }
 0x3a9   : > { %v1321_v44 = vmax.f32 %v1309_v33, 0.0 }
 0x3aa   : > { %v1326_v45 = vpack.c.bf16 %v1323_v37, %v1322_v36 }
 0x3ab   : > { %v1325_v46 = vpack.c.bf16 %v1321_v44, %v1320_v43 }
 0x3ad   : > { %2051 = vmatprep.mubr.msk.bf16.mxu0 %vm1335_vm3, %v1325_v46 }
 0x3ae   : > { %2052 = vmatmul.mubr.msk.bf16.vlgmr.msra.gmra.mrb[8].mxu0 %vm1335_vm3, %v1326_v45 }
 0x481   : > { %v2053_v51 = vpop.f32.mrb[8].mxu0 }
 0x482   : > { %v3184_v52 = vadd.f32 %v2053_v51, %v1986_v50  ;;  %v1380_v53 = vpop.f32.mrb[9].mxu0 }
 0x483   : > { %v3186_v54 = vadd.f32 %v1986_v50, %v1380_v53  ;;  %v2054_v55 = vpop.f32.mrb[10].mxu0 }
 0x484   : > { %v3190_v56 = vcombine.high %v3184_v52, %v3184_v52  ;;  %v1436_v57 = vsel %vm1407_vm4, %v3184_v52, -inf  ;;  %v3194_v58 = vadd.f32 %v2054_v55, %v1986_v50  ;;  %v1383_v59 = vpop.f32.mrb[11].mxu0 }
 0x485   : > { %v1437_v60 = vrot.slane %v1436_v57, 4  ;;  %v3198_v61 = vcombine.high %v3186_v54, %v3186_v54  ;;  %v1408_v62 = vsel %vm1407_vm4, %v3186_v54, -inf  ;;  %v3202_v63 = vadd.f32 %v1986_v50, %v1383_v59 }
 0x486   : > { %v1443_v0 = vsel %vm1407_vm4, %v3190_v56, -inf  ;;  %v1409_v1 = vrot.slane %v1408_v62, 4  ;;  %v3208_v6 = vcombine.high %v3194_v58, %v3194_v58  ;;  %v1450_v7 = vsel %vm1407_vm4, %v3194_v58, -inf }
 0x487   : > { %v1438_v8 = vmax.f32 %v1436_v57, %v1437_v60  ;;  %v1444_v9 = vrot.slane %v1443_v0, 4  ;;  %v1415_v10 = vsel %vm1407_vm4, %v3198_v61, -inf  ;;  %v1451_v11 = vrot.slane %v1450_v7, 4 }
 0x488   : > { %v1410_v12 = vmax.f32 %v1408_v62, %v1409_v1  ;;  %v1416_v13 = vrot.slane %v1415_v10, 4  ;;  %v1457_v14 = vsel %vm1407_vm4, %v3208_v6, -inf  ;;  %v3218_v15 = vcombine.high %v3202_v63, %v3202_v63 }
 0x489   : > { %v1439_v16 = vrot.slane %v1438_v8, 2  ;;  %v1445_v17 = vmax.f32 %v1443_v0, %v1444_v9  ;;  %v1452_v18 = vmax.f32 %v1450_v7, %v1451_v11  ;;  %v1458_v19 = vrot.slane %v1457_v14, 4 }
 0x48a   : > { %v1411_v20 = vrot.slane %v1410_v12, 2  ;;  %v1417_v21 = vmax.f32 %v1415_v10, %v1416_v13  ;;  %v1422_v22 = vsel %vm1407_vm4, %v3202_v63, -inf  ;;  %v1429_v23 = vsel %vm1407_vm4, %v3218_v15, -inf }
 0x48b   : > { %v1440_v24 = vmax.f32 %v1438_v8, %v1439_v16  ;;  %v1446_v25 = vrot.slane %v1445_v17, 2  ;;  %v1453_v26 = vrot.slane %v1452_v18, 2  ;;  %v1459_v27 = vmax.f32 %v1457_v14, %v1458_v19 }
 0x48c   : > { %v1412_v28 = vmax.f32 %v1410_v12, %v1411_v20  ;;  %v1418_v29 = vrot.slane %v1417_v21, 2  ;;  %v1423_v30 = vrot.slane %v1422_v22, 4  ;;  %v1430_v31 = vrot.slane %v1429_v23, 4 }
 0x48d   : > { %v1441_v32 = vrot.slane %v1440_v24, 1  ;;  %v1447_v34 = vmax.f32 %v1445_v17, %v1446_v25  ;;  %v1454_v35 = vmax.f32 %v1452_v18, %v1453_v26  ;;  %v1460_v38 = vrot.slane %v1459_v27, 2 }
 0x48e   : > { %v1413_v39 = vrot.slane %v1412_v28, 1  ;;  %v1419_v40 = vmax.f32 %v1417_v21, %v1418_v29  ;;  %v1424_v41 = vmax.f32 %v1422_v22, %v1423_v30  ;;  %v1431_v42 = vmax.f32 %v1429_v23, %v1430_v31 }
 0x48f   : > { %v1442_v33 = vmax.f32 %v1440_v24, %v1441_v32  ;;  %v1448_v36 = vrot.slane %v1447_v34, 1  ;;  %v1455_v37 = vrot.slane %v1454_v35, 1  ;;  %v1461_v43 = vmax.f32 %v1459_v27, %v1460_v38 }
 0x490   : > { %v1414_v44 = vmax.f32 %v1412_v28, %v1413_v39  ;;  %v1420_v45 = vrot.slane %v1419_v40, 1  ;;  %v1425_v46 = vrot.slane %v1424_v41, 2  ;;  %v1432_v47 = vrot.slane %v1431_v42, 2 }
 0x491   : > { %v1449_v48 = vmax.f32 %v1447_v34, %v1448_v36  ;;  %v1468_v49 = vsub.f32 %v3184_v52, %v1442_v33  ;;  %v1456_v50 = vmax.f32 %v1454_v35, %v1455_v37  ;;  %v1462_v51 = vrot.slane %v1461_v43, 1 }
 0x492   : > { %v1421_v53 = vmax.f32 %v1419_v40, %v1420_v45  ;;  %v1464_v55 = vsub.f32 %v3186_v54, %v1414_v44  ;;  %v1426_v57 = vmax.f32 %v1424_v41, %v1425_v46  ;;  %v1433_v59 = vmax.f32 %v1431_v42, %v1432_v47 }
 0x493   : > { %v1469_v60 = vsub.f32 %v3190_v56, %v1449_v48  ;;  %v1480_v62 = vmul.f32 1.442695, %v1468_v49  ;;  %v1463_v0 = vmax.f32 %v1461_v43, %v1462_v51  ;;  %v1470_v1 = vsub.f32 %v3194_v58, %v1456_v50 }
 0x494   : > { %v1465_v7 = vsub.f32 %v3198_v61, %v1421_v53  ;;  %v1472_v8 = vmul.f32 1.442695, %v1464_v55  ;;  %v1427_v9 = vrot.slane %v1426_v57, 1  ;;  %v1434_v10 = vrot.slane %v1433_v59, 1 }
 0x495   : > { %2222 = vpow2.f32 %v1480_v62  ;;  %v1482_v52 = vmul.f32 1.442695, %v1469_v60  ;;  %v1471_v11 = vsub.f32 %v3208_v6, %v1463_v0  ;;  %v1484_v12 = vmul.f32 1.442695, %v1470_v1 }
 0x496   : > { %2224 = vpow2.f32 %v1472_v8  ;;  %v1474_v54 = vmul.f32 1.442695, %v1465_v7  ;;  %v1428_v13 = vmax.f32 %v1426_v57, %v1427_v9  ;;  %v1435_v14 = vmax.f32 %v1433_v59, %v1434_v10 }
 0x497   : > { %2226 = vpow2.f32 %v1482_v52  ;;  %v1486_v56 = vmul.f32 1.442695, %v1471_v11 }
 0x498   : > { %2228 = vpow2.f32 %v1474_v54  ;;  %v1466_v16 = vsub.f32 %v3202_v63, %v1428_v13  ;;  %v1467_v58 = vsub.f32 %v3218_v15, %v1435_v14 }
 0x499   : > { %2230 = vpow2.f32 %v1484_v12 }
 0x49a   : > { %2232 = vpow2.f32 %v1486_v56  ;;  %v1476_v61 = vmul.f32 1.442695, %v1466_v16  ;;  %v1478_v17 = vmul.f32 1.442695, %v1467_v58 }
 0x49c   : > { %2234 = vpow2.f32 %v1476_v61 }
 0x49d   : > { %2236 = vpow2.f32 %v1478_v17 }
 0x49f   : > { %v3232_v18 = vpop.eup %2222 }
 0x4a0   : > { %v3234_v6 = vpop.eup %2224  ;;  %v1516_v19 = vsel %vm1407_vm4, %v3232_v18, 0.0 }
 0x4a1   : > { %v3238_v20 = vpop.eup %2226  ;;  %v1517_v21 = vrot.slane %v1516_v19, 4  ;;  %v1488_v63 = vsel %vm1407_vm4, %v3234_v6, 0.0 }
 0x4a2   : > { %v3242_v15 = vpop.eup %2228  ;;  %v1523_v22 = vsel %vm1407_vm4, %v3238_v20, 0.0  ;;  %v1489_v23 = vrot.slane %v1488_v63, 4 }
 0x4a3   : > { %v3246_v24 = vpop.eup %2230  ;;  %v1518_v25 = vadd.f32 %v1517_v21, %v1516_v19  ;;  %v1524_v26 = vrot.slane %v1523_v22, 4  ;;  %v1495_v27 = vsel %vm1407_vm4, %v3242_v15, 0.0 }
 0x4a4   : > { %v3250_v28 = vpop.eup %2232  ;;  %v1490_v29 = vadd.f32 %v1489_v23, %v1488_v63  ;;  %v1496_v30 = vrot.slane %v1495_v27, 4  ;;  %v1530_v31 = vsel %vm1407_vm4, %v3246_v24, 0.0 }
 0x4a5   : > { %v1519_v32 = vrot.slane %v1518_v25, 2  ;;  %v1525_v34 = vadd.f32 %v1524_v26, %v1523_v22  ;;  %v1531_v35 = vrot.slane %v1530_v31, 4  ;;  %v1537_v38 = vsel %vm1407_vm4, %v3250_v28, 0.0 }
 0x4a6   : > { %v3256_v39 = vpop.eup %2234  ;;  %v1491_v40 = vrot.slane %v1490_v29, 2  ;;  %v1497_v41 = vadd.f32 %v1496_v30, %v1495_v27  ;;  %v1538_v42 = vrot.slane %v1537_v38, 4 }
 0x4a7   : > { %v3258_v33 = vpop.eup %2236  ;;  %v1520_v36 = vadd.f32 %v1519_v32, %v1518_v25  ;;  %v1526_v37 = vrot.slane %v1525_v34, 2  ;;  %v1532_v43 = vadd.f32 %v1531_v35, %v1530_v31  ;;  %v1502_v44 = vsel %vm1407_vm4, %v3256_v39, 0.0 }
 0x4a8   : > { %v1492_v45 = vadd.f32 %v1491_v40, %v1490_v29  ;;  %v1498_v46 = vrot.slane %v1497_v41, 2  ;;  %v1539_v47 = vadd.f32 %v1538_v42, %v1537_v38  ;;  %v1503_v48 = vrot.slane %v1502_v44, 4 }
 0x4a9   : > { %v1521_v49 = vrot.slane %v1520_v36, 1  ;;  %v1527_v50 = vadd.f32 %v1526_v37, %v1525_v34  ;;  %v1533_v51 = vrot.slane %v1532_v43, 2  ;;  %v1509_v53 = vsel %vm1407_vm4, %v3258_v33, 0.0 }
 0x4aa   : > { %v1499_v55 = vadd.f32 %v1498_v46, %v1497_v41  ;;  %v1540_v57 = vrot.slane %v1539_v47, 2  ;;  %v1504_v59 = vadd.f32 %v1503_v48, %v1502_v44  ;;  %v1493_v62 = vrot.slane %v1492_v45, 1 }
 0x4ab   : > { %v1528_v60 = vrot.slane %v1527_v50, 1  ;;  %v1534_v0 = vadd.f32 %v1533_v51, %v1532_v43  ;;  %v1510_v1 = vrot.slane %v1509_v53, 4  ;;  %v1522_v7 = vadd.f32 %v1521_v49, %v1520_v36 }
 0x4ac   : > { %v1500_v8 = vrot.slane %v1499_v55, 1  ;;  %v1541_v9 = vadd.f32 %v1540_v57, %v1539_v47  ;;  %v1505_v10 = vrot.slane %v1504_v59, 2  ;;  %v1494_v58 = vadd.f32 %v1493_v62, %v1492_v45 }
 0x4ad   : > { %v1529_v52 = vadd.f32 %v1528_v60, %v1527_v50  ;;  %v1535_v11 = vrot.slane %v1534_v0, 1  ;;  %v1511_v12 = vadd.f32 %v1510_v1, %v1509_v53 }
 0x4ae   : > { %v1542_v54 = vrot.slane %v1541_v9, 1  ;;  %v1506_v13 = vadd.f32 %v1505_v10, %v1504_v59  ;;  %v1501_v16 = vadd.f32 %v1500_v8, %v1499_v55 }
 0x4af   : > { %2238 = vrcp.f32 %v1529_v52  ;;  %v1536_v14 = vadd.f32 %v1535_v11, %v1534_v0  ;;  %v1512_v56 = vrot.slane %v1511_v12, 2 }
 0x4b0   : > { %2240 = vrcp.f32 %v1522_v7  ;;  %v1543_v61 = vadd.f32 %v1542_v54, %v1541_v9  ;;  %v1507_v17 = vrot.slane %v1506_v13, 1 }
 0x4b1   : > { %2242 = vrcp.f32 %v1536_v14  ;;  %v1513_v19 = vadd.f32 %v1512_v56, %v1511_v12 }
 0x4b2   : > { %2244 = vrcp.f32 %v1543_v61  ;;  %v1508_v21 = vadd.f32 %v1507_v17, %v1506_v13 }
 0x4b3   : > { %v1514_v63 = vrot.slane %v1513_v19, 1  ;;  %2246 = vrcp.f32 %v1501_v16 }
 0x4b4   : > { %2248 = vrcp.f32 %v1494_v58 }
 0x4b5   : > { %v1515_v22 = vadd.f32 %v1514_v63, %v1513_v19  ;;  %2250 = vrcp.f32 %v1508_v21 }
 0x4b7   : > { %2252 = vrcp.f32 %v1515_v22 }
 0x4b9   : > { %v2239_v23 = vpop.eup %2238 }
 0x4ba   : > { %v2241_v25 = vpop.eup %2240  ;;  %v1557_v27 = vmul.f32 %v2239_v23, %v3238_v20 }
 0x4bb   : > { %v2243_v26 = vpop.eup %2242  ;;  %v1556_v31 = vmul.f32 %v2241_v25, %v3232_v18 }
 0x4bc   : > { %v2245_v29 = vpop.eup %2244  ;;  %v1558_v32 = vmul.f32 %v2243_v26, %v3246_v24 }
 0x4bd   : > { %v2247_v30 = vpop.eup %2246  ;;  %v1559_v34 = vmul.f32 %v2245_v29, %v3250_v28  ;;  %v1571_v40 = vcombine.low %v1556_v31, %v1557_v27 }
 0x4be   : > { %v2249_v35 = vpop.eup %2248  ;;  %v1553_v42 = vmul.f32 %v2247_v30, %v3242_v15 }
 0x4bf   : > { %v2251_v38 = vpop.eup %2250  ;;  %v1572_v41 = vcombine.low %v1558_v32, %v1559_v34  ;;  %v1552_v43 = vmul.f32 %v2249_v35, %v3234_v6  ;;  %v1223_v6 = vpop.permute.xlu1 %1222 }
 0x4c0   : > { %v1554_v20 = vmul.f32 %v2251_v38, %v3256_v39  ;;  %v1232_v12 = vadd.f32 %v1223_v6, %v3091_v4 }
 0x4c1   : > { %v2253_v36 = vpop.eup %2252  ;;  %v1578_v37 = vpack.c.bf16 %v1572_v41, %v1571_v40  ;;  %v1569_v45 = vcombine.low %v1552_v43, %v1553_v42 }
 0x4c2   : > { %v1555_v44 = vmul.f32 %v2253_v36, %v3258_v33  ;;  %v1219_v33 = vpop.permute.xlu0 %1218 }
 0x4c3   : > { %v1221_v39 = vpop.permute.xlu1 %1220  ;;  %v1230_v49 = vadd.f32 %v1219_v33, %v3083_v2 }
 0x4c4   : > { %v1570_v18 = vcombine.low %v1554_v20, %v1555_v44  ;;  %v1231_v59 = vadd.f32 %v1221_v39, %v3087_v3 }
 0x4c6   : > { %v1577_v46 = vpack.c.bf16 %v1570_v18, %v1569_v45 }
 0x4c7   : > { %v1225_v48 = vpop.permute.xlu1 %1224 }
 0x4c8   : > { %2057 = vmatprep.mubr.msk.bf16.mxu1 %vm1335_vm3, %v1577_v46  ;;  %v1233_v50 = vadd.f32 %v1225_v48, %v3093_v5 }
 0x4c9   : > { %2058 = vmatmul.mubr.msk.bf16.vlgmr.msra.gmra.mrb[8].mxu1 %vm1335_vm3, %v1578_v37 }
 0x59c   : > { %v2059_v24 = vpop.f32.mrb[8].mxu1 }
 0x59d   : > { %v1623_v28 = vpop.f32.mrb[9].mxu1 }
 0x59e   : > { %1642 = vrot.lane.b32.xlu0 %v1623_v28, %s2631_s8  ;;  %v2060_v15 = vpop.f32.mrb[10].mxu1 }
 0x59f   : > { %1648 = vrot.lane.b32.xlu1 %v2060_v15, %s2631_s8  ;;  %v1626_v47 = vpop.f32.mrb[11].mxu1 }
 0x5a2   : > { %1644 = vrot.lane.b32.xlu0 %v1626_v47, %s2631_s8 }
 0x5a6   : > { %1646 = vrot.lane.b32.xlu0 %v2059_v24, %s2631_s8  ;;  %s713_s8 = scalar_lea.vmem [#allocation17], %s1957_s17  ;;  %s2633_s17 = smov [#allocation17]  }
 0x5a7   : > { %s1768_s7 = sshll.u32 %s713_s8, 4  ;;  %s2514_s3 = sshll.u32 %s2633_s17, 4  ;;  %s3298_s7 = int_to_ptr.vmem [resolvable:$true] %s1768_s7  ;;  %s2515_s3 = int_to_ptr.vmem [resolvable:$false] %s2514_s3 }
 0x5a8   : > { %s2510_s21 = scalar_lea.vmem %s3298_s7, 128  ;;  %s2516_s14 = scalar_lea.vmem %s2515_s3, 256 }
 0x5a9   : > { %p2511_p13 = scmp.ne.s32.totalorder %s3298_s7, %s2510_s21  ;;  %p2517_p0 = scmp.lt.s32.totalorder %s3298_s7, %s2515_s3 }
 0x5aa   : > { %p2518_p7 = scmp.lt.s32.totalorder %s2516_s14, %s2510_s21 }
 0x5ab   : > { %p2512_p11 = pnand %p2511_p13, %p3426_p2 }
 0x5ac   : > { %p2519_p5 = por %p2518_p7, %p2517_p0 }
 0x5ad   : > { %p2513_p12 = pneg %p2512_p11 }
 0x5af   : > { %p2520_p4 = pnand %p2519_p5, %p2513_p12 }
 0x610   : > { %v1643_v51 = vpop.permute.xlu0 %1642 }
 0x611   : > { %v1654_v53 = vmul.f32 %v1643_v51, %v1230_v49  ;;  %v1649_v55 = vpop.permute.xlu1 %1648 }
 0x612   : > { %v1657_v57 = vmul.f32 %v1649_v55, %v1233_v50 }
 0x613   : > { %v1662_v60 = vcombine.high %v1654_v53, %v1654_v53  ;;  %v1671_v62 = vsel %vm1670_vm5, %v1654_v53, 0.0 }
 0x614   : > { %v1672_v0 = vrot.slane %v1671_v62, 4  ;;  %v1665_v1 = vcombine.high %v1657_v57, %v1657_v57  ;;  %v1713_v7 = vsel %vm1670_vm5, %v1657_v57, 0.0  ;;  %v1645_v8 = vpop.permute.xlu0 %1644 }
 0x615   : > { %v1678_v9 = vsel %vm1670_vm5, %v1662_v60, 0.0  ;;  %v1714_v2 = vrot.slane %v1713_v7, 4  ;;  %v1655_v10 = vmul.f32 %v1645_v8, %v1231_v59 }
 0x616   : > { %v1673_v5 = vadd.f32 %v1672_v0, %v1671_v62  ;;  %v1679_v52 = vrot.slane %v1678_v9, 4  ;;  %v1720_v11 = vsel %vm1670_vm5, %v1665_v1, 0.0 }
 0x617   : > { %v1721_v54 = vrot.slane %v1720_v11, 4  ;;  %v1663_v3 = vcombine.high %v1655_v10, %v1655_v10  ;;  %v1685_v13 = vsel %vm1670_vm5, %v1655_v10, 0.0  ;;  %v1715_v61 = vadd.f32 %v1714_v2, %v1713_v7 }
 0x618   : > { %v1674_v14 = vrot.slane %v1673_v5, 2  ;;  %v1680_v56 = vadd.f32 %v1679_v52, %v1678_v9  ;;  %v1686_v16 = vrot.slane %v1685_v13, 4  ;;  %v1647_v58 = vpop.permute.xlu0 %1646 }
 0x619   : > { %v1692_v17 = vsel %vm1670_vm5, %v1663_v3, 0.0  ;;  %v1656_v19 = vmul.f32 %v1647_v58, %v1232_v12  ;;  %v1722_v25 = vadd.f32 %v1721_v54, %v1720_v11  ;;  %v1716_v38 = vrot.slane %v1715_v61, 2 }
 0x61a   : > { %v1675_v21 = vadd.f32 %v1674_v14, %v1673_v5  ;;  %v1681_v63 = vrot.slane %v1680_v56, 2  ;;  %v1687_v22 = vadd.f32 %v1686_v16, %v1685_v13  ;;  %v1693_v23 = vrot.slane %v1692_v17, 4 }
 0x61b   : > { %v1664_v26 = vcombine.high %v1656_v19, %v1656_v19  ;;  %v1699_v4 = vsel %vm1670_vm5, %v1656_v19, 0.0  ;;  %v1723_v42 = vrot.slane %v1722_v25, 2  ;;  %v1717_v28 = vadd.f32 %v1716_v38, %v1715_v61 }
 0x61c   : > { %v1676_v27 = vrot.slane %v1675_v21, 1  ;;  %v1682_v29 = vadd.f32 %v1681_v63, %v1680_v56  ;;  %v1688_v30 = vrot.slane %v1687_v22, 2  ;;  %v1694_v31 = vadd.f32 %v1693_v23, %v1692_v17 }
 0x61d   : > { %v1700_v32 = vrot.slane %v1699_v4, 4  ;;  %v1706_v34 = vsel %vm1670_vm5, %v1664_v26, 0.0  ;;  %v1724_v6 = vadd.f32 %v1723_v42, %v1722_v25  ;;  %v1718_v53 = vrot.slane %v1717_v28, 1 }
 0x61e   : > { %v1683_v35 = vrot.slane %v1682_v29, 1  ;;  %v1689_v40 = vadd.f32 %v1688_v30, %v1687_v22  ;;  %v1695_v41 = vrot.slane %v1694_v31, 2  ;;  %v1707_v37 = vrot.slane %v1706_v34, 4 }
 0x61f   : > { %v1701_v36 = vadd.f32 %v1700_v32, %v1699_v4  ;;  %v1677_v43 = vadd.f32 %v1676_v27, %v1675_v21  ;;  %v1725_v60 = vrot.slane %v1724_v6, 1  ;;  %v1719_v1 = vadd.f32 %v1718_v53, %v1717_v28 }
 0x620   : > { %v1684_v20 = vadd.f32 %v1683_v35, %v1682_v29  ;;  %v1690_v44 = vrot.slane %v1689_v40, 1  ;;  %v1696_v45 = vadd.f32 %v1695_v41, %v1694_v31  ;;  %v1708_v46 = vadd.f32 %v1707_v37, %v1706_v34 }
 0x621   : > { %v1702_v18 = vrot.slane %v1701_v36, 2  ;;  %v1726_v7 = vadd.f32 %v1725_v60, %v1724_v6 }
 0x622   : > { %v1736_v24 = vsel %vm1735_vm6, %v1684_v20, %v1677_v43  ;;  %v1691_v15 = vadd.f32 %v1690_v44, %v1689_v40  ;;  %v1697_v47 = vrot.slane %v1696_v45, 1  ;;  %v1709_v33 = vrot.slane %v1708_v46, 2 }
 0x623   : > { %v1703_v39 = vadd.f32 %v1702_v18, %v1701_v36 }
 0x624   : > { %v1698_v48 = vadd.f32 %v1697_v47, %v1696_v45  ;;  %v1738_v49 = vsel %vm1737_vm7, %v1691_v15, %v1736_v24  ;;  %v1710_v51 = vadd.f32 %v1709_v33, %v1708_v46 }
 0x625   : > { %v1704_v50 = vrot.slane %v1703_v39, 1 }
 0x626   : > { %v1740_v55 = vsel %vm1739_vm8, %v1698_v48, %v1738_v49  ;;  %v1711_v59 = vrot.slane %v1710_v51, 1 }
 0x627   : > { %v1705_v57 = vadd.f32 %v1704_v50, %v1703_v39 }
 0x628   : > { %v1712_v62 = vadd.f32 %v1711_v59, %v1710_v51 }
 0x629   : > { %v1742_v0 = vsel %vm1741_vm9, %v1705_v57, %v1740_v55 }
 0x62a   : > { %v1744_v8 = vsel %vm1743_vm10, %v1712_v62, %v1742_v0 }
 0x62b   : > { %v1746_v9 = vsel %vm1745_vm11, %v1719_v1, %v1744_v8 }
 0x62c   : > { %v1748_v2 = vsel %vm1747_vm12, %v1726_v7, %v1746_v9 }
 0x62d   : > { %1749 = vrot.lane.b32.xlu0 %v1748_v2, %s2632_s22 }
 0x69f   : > { %v1750_v10 = vpop.permute.xlu0 %1749 }
 0x6a0   : > { %1752 = vst.msk [vmem:[%s713_s8] sm:$0xff] %vm731_vm1, %v1750_v10 }
 0x6a1   : > { %2523 = shalt.err (!%p2520_p4)
}
 0x6a2   : > { %s2524_s13 = scalar_lea.hbm %s3296_s0, 128  ;;  %s2528_s15 = scalar_lea.hbm %s3425_s16, 256 }
 0x6a3   : > { %p2525_p8 = scmp.ne.s32.totalorder %s3296_s0, %s2524_s13  ;;  %p2529_p3 = scmp.lt.u32.totalorder %s3296_s0, %s3425_s16 }
 0x6a4   : > { %p2530_p6 = scmp.lt.u32.totalorder %s2528_s15, %s2524_s13  ;;  %p2532_p13 = scmp.lt.u32.totalorder %s2524_s13, %s3296_s0 }
 0x6a5   : > { %p2526_p9 = pnand %p2525_p8, %p3426_p2 }
 0x6a6   : > { %p2531_p10 = por %p2530_p6, %p2529_p3 }
 0x6a7   : > { %p2527_p1 = pneg %p2526_p9 }
 0x6a8   : > { %p2533_p11 = por %p2532_p13, %p2531_p10 }
 0x6aa   : > { %p2534_p12 = pnand %p2533_p11, %p2527_p1 }
 0x6ac   : > { %2537 = shalt.err (!%p2534_p12)
}
 0x6ad   : > { %2095 = dma.vmem_to_hbm [thread:$0]  (%p3426_p2), %s3298_s7, 128, %s3296_s0, %s1754_s19  }
 0x6ae PF: > { %s1780_s18 = sand.u32 1, %s2592_s24   ;;  %p3427_p0 = scmp.ne.s32.totalorder %s3403_s4, 0 }
 0x6af   : > { %p3428_p7 = scmp.ge.s32.totalorder %s2612_s29, 2  ;;  %s1781_s8 = scalar_lea.sflag [#allocation4], %s1780_s18 }
 0x6b1   : > { %p2127_p5 = pnand %p3428_p7, %p3427_p0 }
 0x6b3   : > { %2587 = dma.done.wait (!%p2127_p5), %s1781_s8, 128  }
 0x6b4   : > { %2589 = vsyncadd (!%p2127_p5), %s1781_s8, 4294967168  ;;  %s39_s29 = sadd.s32 1, %s2612_s29   ;;  %s3429_s24 = smov %s2596_s25 }
 0x6b5   : > { %p36_p4 = scmp.ge.s32.totalorder %s39_s29, 4   ;;  %s3430_s25 = smov %s2600_s26 }
 0x6b6   : > { %s3431_s26 = smov %s2953_s27  ;;  %s3432_s27 = smov %s2608_s28 }
 0x6b7   : > { %s3433_s28 = smov %s3435_s5  ;;  %38 = sbr.rel (!%p36_p4) target bundleno = 27 (0x1b), region = 174 }
 0x6be   :  { %1786 = vsyncpa [#allocation3], 1 }
 0x6bf   :  { %1788 = vsyncpa [#allocation3 + $0x1], 1 }
 0x6c0   :  { %1789 = vsyncpa [#allocation6], 1 }
 0x6c1   :  { %1791 = vsyncpa [#allocation6 + $0x1], 1 }
 0x6c2   :  { %1792 = vsyncpa [#allocation9], 1 }
 0x6c3   :  { %1793 = vsyncpa [#allocation12], 1 }
 0x6c4   :  { %1794 = vsyncpa [#allocation15], 1 }
 0x6c5   :  { %1795 = vsyncpa [#allocation4], 1 }
 0x6c6   :  { %1797 = vsyncpa [#allocation4 + $0x1], 1 }

</bundles_post_ra>
